<compile_context>
chip_gen: v5e
topology: v5e:2x2
jax: 0.10.0
libtpu: 0.0.40
codegen_flags: <defaults>
</compile_context>

<pallas_src>
import functools

import jax
import jax.numpy as jnp
from jax.experimental import pallas as pl
from jax.experimental.pallas import tpu as pltpu

SLOT_NAMES = ["wh", "aux", "subj", "verb", "obj", "prep", "obj2"]
SLOT_VOCAB_SIZES = {"wh": 12, "aux": 10, "subj": 5, "verb": 8,
                    "obj": 5, "prep": 20, "obj2": 5}


def make_kernel(num_layers: int, hidden: int, num_slots: int, batch: int,
                matmul_dtype=jnp.float32):
    H, S, B = hidden, num_slots, batch
    H4 = 4 * H
    l0_is_top = (num_layers == 1)

    def mm_cast(v):
        return v if matmul_dtype == jnp.float32 else v.astype(matmul_dtype)

    def lstm_from_gates(gates, c_prev):
        # g-gate preactivation columns were pre-scaled by 2 at pack time, so
        # tanh(z_g) == 2*sigmoid(2*z_g) - 1 falls out of the same full-width
        # sigmoid pass (no separate tanh EUP round trip on the chain).
        sig = jax.nn.sigmoid(gates)
        i_g = sig[:, 0 * H:1 * H]
        f_g = sig[:, 1 * H:2 * H]
        g_g = 2.0 * sig[:, 2 * H:3 * H] - 1.0
        o_g = sig[:, 3 * H:4 * H]
        c_new = i_g * g_g if c_prev is None else f_g * c_prev + i_g * g_g
        h_new = o_g * jnp.tanh(c_new)
        return h_new, c_new

    def kernel(pre0_ref, r0_ref, *rest):
        # rest = [per layer l>=1: wx, r, bias], then out_ref.
        deep = rest[:3 * (num_layers - 1)]
        out_ref = rest[3 * (num_layers - 1)]

        c = [None] * num_layers        # cell states, live in vregs
        hcarry = [None] * num_layers   # h_prev @ w_hh[s] (g-scaled), carried
        h_top = None

        # Fully unrolled serial slot recurrence (7 x L straight-line body).
        for s in range(S):
            last = (s == S - 1)

            # ---------------- layer 0 ----------------
            pre = pre0_ref[s]                       # (B, 6H) [or (B, 4H) if top]
            gates = pre[:, :H4]                     # x@w_ih0 + b0 (precomputed)
            if hcarry[0] is not None:               # slot 0: h = 0, skip
                gates = gates + hcarry[0]
            h0, c[0] = lstm_from_gates(gates, c[0])

            if l0_is_top:
                if last:
                    h_top = h0
                else:
                    hcarry[0] = jnp.dot(mm_cast(h0), r0_ref[s],
                                        preferred_element_type=jnp.float32)
                continue

            # Fused recurrent + highway-h projection: ONE MXU round trip.
            #   lanes [0:4H]  = h0 @ w_hh0[s+1]   (next slot's recurrent term)
            #   lanes [4H:5H] = h0 @ w_nlh0[s]    (this slot's highway gate)
            hr = jnp.dot(mm_cast(h0), r0_ref[s],
                         preferred_element_type=jnp.float32)        # (B, 5H)
            hcarry[0] = hr[:, :H4]
            # TODO(synk): recurrent dropout is identity in eval mode.
            gate = jax.nn.sigmoid(pre[:, H4:H4 + H] + hr[:, H4:H4 + H])
            x = gate * h0 + (1.0 - gate) * pre[:, H4 + H:H4 + 2 * H]

            # ---------------- layers >= 1 ----------------
            for l in range(1, num_layers):
                wx_ref, r_ref, b_ref = deep[3 * (l - 1):3 * l]
                is_top = (l == num_layers - 1)
                b = b_ref[s]
                # Fused x-side projection [w_ih | w_nl_x | w_lin] -> (B, 6H)
                # (top layer carries only w_ih -> (B, 4H)).
                xp = jnp.dot(mm_cast(x), wx_ref[s],
                             preferred_element_type=jnp.float32)
                gates = xp[:, :H4] + b[:, :H4]
                if hcarry[l] is not None:
                    gates = gates + hcarry[l]
                hl, c[l] = lstm_from_gates(gates, c[l])

                if is_top:
                    # Top layer's highway output is never consumed; only the
                    # recurrent carry is needed (and nothing at the last slot).
                    if last:
                        h_top = hl
                    else:
                        hcarry[l] = jnp.dot(mm_cast(hl), r_ref[s],
                                            preferred_element_type=jnp.float32)
                else:
                    hr = jnp.dot(mm_cast(hl), r_ref[s],
                                 preferred_element_type=jnp.float32)  # (B, 5H)
                    hcarry[l] = hr[:, :H4]
                    gate = jax.nn.sigmoid(
                        xp[:, H4:H4 + H] + hr[:, H4:H4 + H] + b[:, H4:H4 + H])
                    x = gate * hl + (1.0 - gate) * xp[:, H4 + H:H4 + 2 * H]

        # Single output store, after the last slot.
        out_ref[...] = h_top

    return kernel


def pack_params(params, *, num_layers, hidden, matmul_dtype=jnp.float32):
    """One-time packing of raw weights into the fused kernel layout.

    All concatenation, w_nl x/h splitting, slot-shifted w_hh pairing and
    g-gate pre-scaling happen here (never per call inside jit).
    """
    H = hidden
    w_ih0 = params["w_ih"][0]
    S, D0, _ = w_ih0.shape

    def scale_g(w):      # tanh(z) = 2*sigmoid(2z)-1  -> pre-scale g columns
        return w.at[..., 2 * H:3 * H].multiply(2.0)

    def hh_next(w_hh):   # pair slot s with w_hh[s+1]; last slot block unused
        return jnp.concatenate([w_hh[1:], jnp.zeros_like(w_hh[:1])], axis=0)

    l0_is_top = (num_layers == 1)
    wd = matmul_dtype

    if l0_is_top:
        w0x = scale_g(w_ih0)                                      # (S, D0, 4H)
        b0 = scale_g(params["b"][0])                              # (S, 1, 4H)
        r0 = hh_next(scale_g(params["w_hh"][0])).astype(wd)       # (S, H, 4H)
    else:
        w_nl0 = params["w_nl"][0]                                 # (S, D0+H, H)
        w0x = jnp.concatenate(                                    # (S, D0, 6H)
            [scale_g(w_ih0), w_nl0[:, :D0, :], params["w_lin"][0]], axis=-1)
        b0 = jnp.concatenate(                                     # (S, 1, 6H)
            [scale_g(params["b"][0]), params["b_nl"][0],
             jnp.zeros((S, 1, H), w_ih0.dtype)], axis=-1)
        r0 = jnp.concatenate(                                     # (S, H, 5H)
            [hh_next(scale_g(params["w_hh"][0])), w_nl0[:, D0:, :]],
            axis=-1).astype(wd)

    deep = []
    for l in range(1, num_layers):
        is_top = (l == num_layers - 1)
        w_ih = scale_g(params["w_ih"][l])                         # (S, H, 4H)
        w_hh_n = hh_next(scale_g(params["w_hh"][l]))              # (S, H, 4H)
        b = scale_g(params["b"][l])                               # (S, 1, 4H)
        if is_top:
            wx, r, bias = w_ih, w_hh_n, b
        else:
            w_nl = params["w_nl"][l]                              # (S, 2H, H)
            wx = jnp.concatenate([w_ih, w_nl[:, :H, :], params["w_lin"][l]],
                                 axis=-1)                         # (S, H, 6H)
            r = jnp.concatenate([w_hh_n, w_nl[:, H:, :]], axis=-1)  # (S, H, 5H)
            bias = jnp.concatenate([b, params["b_nl"][l]], axis=-1)  # (S, 1, 5H)
        deep.append((wx.astype(wd), r.astype(wd), bias))
    return {"w0x": w0x, "b0": b0, "r0": r0, "deep": tuple(deep)}


@functools.partial(jax.jit, static_argnames=("num_layers", "hidden"))
def slot_sequence_encode(pred_reps, emb_all, packed, *, num_layers, hidden):
    S, B, E = emb_all.shape
    Din = pred_reps.shape[1]
    H = hidden

    # Slot-parallel layer-0 x projections (independent of the recurrence):
    # ONE fused einsum against [w_ih0 | w_nl0_x | w_lin0] with biases folded.
    x0 = jnp.concatenate(
        [jnp.broadcast_to(pred_reps[None], (S, B, Din)), emb_all], axis=-1)
    pre0 = jnp.einsum("sbd,sdk->sbk", x0, packed["w0x"]) + packed["b0"]

    inputs = [pre0, packed["r0"]]
    for (wx, r, b) in packed["deep"]:
        inputs += [wx, r, b]

    vmem = pl.BlockSpec(memory_space=pltpu.MemorySpace.VMEM)
    return pl.pallas_call(
        make_kernel(num_layers, H, S, B, matmul_dtype=packed["r0"].dtype),
        out_shape=jax.ShapeDtypeStruct((B, H), jnp.float32),
        in_specs=[vmem] * len(inputs),
        out_specs=vmem,
    )(*inputs)


def init_params(key, *, input_dim, emb_dim, hidden, num_layers, num_slots):
    H = hidden
    params = {"emb": [], "w_ih": [], "w_hh": [], "b": [],
              "w_nl": [], "b_nl": [], "w_lin": []}
    keys = iter(jax.random.split(key, 64))
    for n in SLOT_NAMES:
        params["emb"].append(
            0.1 * jax.random.normal(next(keys), (SLOT_VOCAB_SIZES[n], emb_dim),
                                    jnp.float32))
    for l in range(num_layers):
        D = input_dim + emb_dim if l == 0 else H
        params["w_ih"].append(
            0.1 * jax.random.normal(next(keys), (num_slots, D, 4 * H), jnp.float32))
        params["w_hh"].append(
            0.1 * jax.random.normal(next(keys), (num_slots, H, 4 * H), jnp.float32))
        params["b"].append(
            0.1 * jax.random.normal(next(keys), (num_slots, 1, 4 * H), jnp.float32))
        params["w_nl"].append(
            0.1 * jax.random.normal(next(keys), (num_slots, D + H, H), jnp.float32))
        params["b_nl"].append(
            0.1 * jax.random.normal(next(keys), (num_slots, 1, H), jnp.float32))
        params["w_lin"].append(
            0.1 * jax.random.normal(next(keys), (num_slots, D, H), jnp.float32))
    return params


def reference_forward(pred_reps, slot_labels, params, *, num_layers, hidden):
    """Pure-JAX mirror of SlotSequenceEncoder.forward (eval mode)."""
    B = pred_reps.shape[0]
    H = hidden
    h = [jnp.zeros((B, H), jnp.float32) for _ in range(num_layers)]
    c = [jnp.zeros((B, H), jnp.float32) for _ in range(num_layers)]
    last_h = None
    for i, n in enumerate(SLOT_NAMES):
        emb = params["emb"][i][slot_labels[n]]
        x = jnp.concatenate([pred_reps, emb], axis=-1)
        for l in range(num_layers):
            gates = (x @ params["w_ih"][l][i] + h[l] @ params["w_hh"][l][i]
                     + params["b"][l][i])
            i_g = jax.nn.sigmoid(gates[:, :H])
            f_g = jax.nn.sigmoid(gates[:, H:2 * H])
            g_g = jnp.tanh(gates[:, 2 * H:3 * H])
            o_g = jax.nn.sigmoid(gates[:, 3 * H:])
            c[l] = f_g * c[l] + i_g * g_g
            h[l] = o_g * jnp.tanh(c[l])
            gate = jax.nn.sigmoid(
                jnp.concatenate([x, h[l]], -1) @ params["w_nl"][l][i]
                + params["b_nl"][l][i])
            x = gate * h[l] + (1.0 - gate) * (x @ params["w_lin"][l][i])
        last_h = h[num_layers - 1]
    return last_h


if __name__ == "__main__":
    B = 8            # batch
    INPUT_DIM = 32   # pred_rep dim
    EMB_DIM = 16     # slot_embedding_dim
    HIDDEN = 32      # output_dim
    NUM_LAYERS = 2
    NUM_SLOTS = len(SLOT_NAMES)

    key = jax.random.PRNGKey(0)
    k_param, k_pred, k_lab = jax.random.split(key, 3)

    params = init_params(k_param, input_dim=INPUT_DIM, emb_dim=EMB_DIM,
                         hidden=HIDDEN, num_layers=NUM_LAYERS,
                         num_slots=NUM_SLOTS)
    packed = pack_params(params, num_layers=NUM_LAYERS, hidden=HIDDEN,
                         matmul_dtype=jnp.float32)

    pred_reps = jax.random.normal(k_pred, (B, INPUT_DIM), jnp.float32)
    lab_keys = jax.random.split(k_lab, NUM_SLOTS)
    slot_labels = {
        n: jax.random.randint(lab_keys[i], (B,), 0, SLOT_VOCAB_SIZES[n])
        for i, n in enumerate(SLOT_NAMES)
    }

    # Embedding gather (glue, plain JAX), stacked per slot: (num_slots, B, E)
    emb_all = jnp.stack([params["emb"][i][slot_labels[n]]
                         for i, n in enumerate(SLOT_NAMES)], axis=0)

    out = slot_sequence_encode(pred_reps, emb_all, packed,
                               num_layers=NUM_LAYERS, hidden=HIDDEN)
    out = jax.block_until_ready(out)

    ref = reference_forward(pred_reps, slot_labels, params,
                            num_layers=NUM_LAYERS, hidden=HIDDEN)
    ref = jax.block_until_ready(ref)

    assert out.shape == (B, HIDDEN)
    # tanh(z) is evaluated as 2*sigmoid(2z)-1 in the kernel (exact identity,
    # slightly different EUP approximation), so allow a small f32 slack.
    assert jnp.allclose(out, ref, atol=1e-4, rtol=1e-4), \
        f"max abs err {jnp.max(jnp.abs(out - ref))}"
    print("KERNEL_OK")
</pallas_src>

<mosaic_0001>
module attributes {stable_mosaic.version = 11 : i64} {
  func.func @kernel(%arg0: memref<7x8x192xf32, #tpu.memory_space<vmem>>, %arg1: memref<7x32x160xf32, #tpu.memory_space<vmem>>, %arg2: memref<7x32x128xf32, #tpu.memory_space<vmem>>, %arg3: memref<7x32x128xf32, #tpu.memory_space<vmem>>, %arg4: memref<7x1x128xf32, #tpu.memory_space<vmem>>, %arg5: memref<8x32xf32, #tpu.memory_space<vmem>>) attributes {dimension_semantics = [], scalar_prefetch = 0 : i64, scratch_operands = 0 : i64, tpu.core_type = #tpu.core_type<tc>} {
    %c0 = arith.constant 0 : index
    %c0_0 = arith.constant 0 : index
    %c0_1 = arith.constant 0 : index
    %0 = vector.load %arg0[%c0, %c0_0, %c0_1] : memref<7x8x192xf32, #tpu.memory_space<vmem>>, vector<1x8x192xf32>
    %1 = vector.shape_cast %0 : vector<1x8x192xf32> to vector<8x192xf32>
    %2 = vector.extract_strided_slice %1 {offsets = [0, 0], sizes = [8, 128], strides = [1, 1]} : vector<8x192xf32> to vector<8x128xf32>
    %3 = arith.negf %2 : vector<8x128xf32>
    %4 = math.exp %3 : vector<8x128xf32>
    %cst = arith.constant 1.000000e+00 : f32
    %5 = vector.broadcast %cst : f32 to vector<8x128xf32>
    %6 = arith.addf %5, %4 : vector<8x128xf32>
    %7 = arith.divf %5, %6 : vector<8x128xf32>
    %8 = vector.extract_strided_slice %7 {offsets = [0, 0], sizes = [8, 32], strides = [1, 1]} : vector<8x128xf32> to vector<8x32xf32>
    %9 = vector.extract_strided_slice %7 {offsets = [0, 64], sizes = [8, 32], strides = [1, 1]} : vector<8x128xf32> to vector<8x32xf32>
    %cst_2 = arith.constant 2.000000e+00 : f32
    %10 = vector.broadcast %cst_2 : f32 to vector<8x32xf32>
    %11 = arith.mulf %10, %9 : vector<8x32xf32>
    %cst_3 = arith.constant 1.000000e+00 : f32
    %12 = vector.broadcast %cst_3 : f32 to vector<8x32xf32>
    %13 = arith.subf %11, %12 : vector<8x32xf32>
    %14 = vector.extract_strided_slice %7 {offsets = [0, 96], sizes = [8, 32], strides = [1, 1]} : vector<8x128xf32> to vector<8x32xf32>
    %15 = arith.mulf %8, %13 : vector<8x32xf32>
    %16 = math.tanh %15 : vector<8x32xf32>
    %17 = arith.mulf %14, %16 : vector<8x32xf32>
    %c0_4 = arith.constant 0 : index
    %c0_5 = arith.constant 0 : index
    %c0_6 = arith.constant 0 : index
    %18 = vector.load %arg1[%c0_4, %c0_5, %c0_6] : memref<7x32x160xf32, #tpu.memory_space<vmem>>, vector<1x32x160xf32>
    %19 = vector.shape_cast %18 : vector<1x32x160xf32> to vector<32x160xf32>
    %cst_7 = arith.constant dense<0.000000e+00> : vector<8x160xf32>
    %20 = tpu.matmul %17, %19, %cst_7 {dimension_numbers = #tpu.dot_dimension_numbers<[1], [0], [0], [1], [0, 0, 1, 1], [], []>} : vector<8x32xf32>, vector<32x160xf32>, vector<8x160xf32> -> vector<8x160xf32>
    %21 = vector.extract_strided_slice %20 {offsets = [0, 0], sizes = [8, 128], strides = [1, 1]} : vector<8x160xf32> to vector<8x128xf32>
    %22 = vector.extract_strided_slice %1 {offsets = [0, 128], sizes = [8, 32], strides = [1, 1]} : vector<8x192xf32> to vector<8x32xf32>
    %23 = vector.extract_strided_slice %20 {offsets = [0, 128], sizes = [8, 32], strides = [1, 1]} : vector<8x160xf32> to vector<8x32xf32>
    %24 = arith.addf %22, %23 : vector<8x32xf32>
    %25 = arith.negf %24 : vector<8x32xf32>
    %26 = math.exp %25 : vector<8x32xf32>
    %cst_8 = arith.constant 1.000000e+00 : f32
    %27 = vector.broadcast %cst_8 : f32 to vector<8x32xf32>
    %28 = arith.addf %27, %26 : vector<8x32xf32>
    %29 = arith.divf %27, %28 : vector<8x32xf32>
    %30 = arith.mulf %29, %17 : vector<8x32xf32>
    %cst_9 = arith.constant 1.000000e+00 : f32
    %31 = vector.broadcast %cst_9 : f32 to vector<8x32xf32>
    %32 = arith.subf %31, %29 : vector<8x32xf32>
    %33 = vector.extract_strided_slice %1 {offsets = [0, 160], sizes = [8, 32], strides = [1, 1]} : vector<8x192xf32> to vector<8x32xf32>
    %34 = arith.mulf %32, %33 : vector<8x32xf32>
    %35 = arith.addf %30, %34 : vector<8x32xf32>
    %c0_10 = arith.constant 0 : index
    %c0_11 = arith.constant 0 : index
    %c0_12 = arith.constant 0 : index
    %36 = vector.load %arg4[%c0_10, %c0_11, %c0_12] : memref<7x1x128xf32, #tpu.memory_space<vmem>>, vector<1x1x128xf32>
    %37 = vector.shape_cast %36 : vector<1x1x128xf32> to vector<1x128xf32>
    %c0_13 = arith.constant 0 : index
    %c0_14 = arith.constant 0 : index
    %c0_15 = arith.constant 0 : index
    %38 = vector.load %arg2[%c0_13, %c0_14, %c0_15] : memref<7x32x128xf32, #tpu.memory_space<vmem>>, vector<1x32x128xf32>
    %39 = vector.shape_cast %38 : vector<1x32x128xf32> to vector<32x128xf32>
    %cst_16 = arith.constant dense<0.000000e+00> : vector<8x128xf32>
    %40 = tpu.matmul %35, %39, %cst_16 {dimension_numbers = #tpu.dot_dimension_numbers<[1], [0], [0], [1], [0, 0, 1, 1], [], []>} : vector<8x32xf32>, vector<32x128xf32>, vector<8x128xf32> -> vector<8x128xf32>
    %41 = vector.broadcast %37 : vector<1x128xf32> to vector<8x128xf32>
    %42 = arith.addf %40, %41 : vector<8x128xf32>
    %43 = arith.negf %42 : vector<8x128xf32>
    %44 = math.exp %43 : vector<8x128xf32>
    %cst_17 = arith.constant 1.000000e+00 : f32
    %45 = vector.broadcast %cst_17 : f32 to vector<8x128xf32>
    %46 = arith.addf %45, %44 : vector<8x128xf32>
    %47 = arith.divf %45, %46 : vector<8x128xf32>
    %48 = vector.extract_strided_slice %47 {offsets = [0, 0], sizes = [8, 32], strides = [1, 1]} : vector<8x128xf32> to vector<8x32xf32>
    %49 = vector.extract_strided_slice %47 {offsets = [0, 64], sizes = [8, 32], strides = [1, 1]} : vector<8x128xf32> to vector<8x32xf32>
    %cst_18 = arith.constant 2.000000e+00 : f32
    %50 = vector.broadcast %cst_18 : f32 to vector<8x32xf32>
    %51 = arith.mulf %50, %49 : vector<8x32xf32>
    %cst_19 = arith.constant 1.000000e+00 : f32
    %52 = vector.broadcast %cst_19 : f32 to vector<8x32xf32>
    %53 = arith.subf %51, %52 : vector<8x32xf32>
    %54 = vector.extract_strided_slice %47 {offsets = [0, 96], sizes = [8, 32], strides = [1, 1]} : vector<8x128xf32> to vector<8x32xf32>
    %55 = arith.mulf %48, %53 : vector<8x32xf32>
    %56 = math.tanh %55 : vector<8x32xf32>
    %57 = arith.mulf %54, %56 : vector<8x32xf32>
    %c0_20 = arith.constant 0 : index
    %c0_21 = arith.constant 0 : index
    %c0_22 = arith.constant 0 : index
    %58 = vector.load %arg3[%c0_20, %c0_21, %c0_22] : memref<7x32x128xf32, #tpu.memory_space<vmem>>, vector<1x32x128xf32>
    %59 = vector.shape_cast %58 : vector<1x32x128xf32> to vector<32x128xf32>
    %cst_23 = arith.constant dense<0.000000e+00> : vector<8x128xf32>
    %60 = tpu.matmul %57, %59, %cst_23 {dimension_numbers = #tpu.dot_dimension_numbers<[1], [0], [0], [1], [0, 0, 1, 1], [], []>} : vector<8x32xf32>, vector<32x128xf32>, vector<8x128xf32> -> vector<8x128xf32>
    %c1 = arith.constant 1 : index
    %c0_24 = arith.constant 0 : index
    %c0_25 = arith.constant 0 : index
    %61 = vector.load %arg0[%c1, %c0_24, %c0_25] : memref<7x8x192xf32, #tpu.memory_space<vmem>>, vector<1x8x192xf32>
    %62 = vector.shape_cast %61 : vector<1x8x192xf32> to vector<8x192xf32>
    %63 = vector.extract_strided_slice %62 {offsets = [0, 0], sizes = [8, 128], strides = [1, 1]} : vector<8x192xf32> to vector<8x128xf32>
    %64 = arith.addf %63, %21 : vector<8x128xf32>
    %65 = arith.negf %64 : vector<8x128xf32>
    %66 = math.exp %65 : vector<8x128xf32>
    %cst_26 = arith.constant 1.000000e+00 : f32
    %67 = vector.broadcast %cst_26 : f32 to vector<8x128xf32>
    %68 = arith.addf %67, %66 : vector<8x128xf32>
    %69 = arith.divf %67, %68 : vector<8x128xf32>
    %70 = vector.extract_strided_slice %69 {offsets = [0, 0], sizes = [8, 32], strides = [1, 1]} : vector<8x128xf32> to vector<8x32xf32>
    %71 = vector.extract_strided_slice %69 {offsets = [0, 32], sizes = [8, 32], strides = [1, 1]} : vector<8x128xf32> to vector<8x32xf32>
    %72 = vector.extract_strided_slice %69 {offsets = [0, 64], sizes = [8, 32], strides = [1, 1]} : vector<8x128xf32> to vector<8x32xf32>
    %cst_27 = arith.constant 2.000000e+00 : f32
    %73 = vector.broadcast %cst_27 : f32 to vector<8x32xf32>
    %74 = arith.mulf %73, %72 : vector<8x32xf32>
    %cst_28 = arith.constant 1.000000e+00 : f32
    %75 = vector.broadcast %cst_28 : f32 to vector<8x32xf32>
    %76 = arith.subf %74, %75 : vector<8x32xf32>
    %77 = vector.extract_strided_slice %69 {offsets = [0, 96], sizes = [8, 32], strides = [1, 1]} : vector<8x128xf32> to vector<8x32xf32>
    %78 = arith.mulf %71, %15 : vector<8x32xf32>
    %79 = arith.mulf %70, %76 : vector<8x32xf32>
    %80 = arith.addf %78, %79 : vector<8x32xf32>
    %81 = math.tanh %80 : vector<8x32xf32>
    %82 = arith.mulf %77, %81 : vector<8x32xf32>
    %c1_29 = arith.constant 1 : index
    %c0_30 = arith.constant 0 : index
    %c0_31 = arith.constant 0 : index
    %83 = vector.load %arg1[%c1_29, %c0_30, %c0_31] : memref<7x32x160xf32, #tpu.memory_space<vmem>>, vector<1x32x160xf32>
    %84 = vector.shape_cast %83 : vector<1x32x160xf32> to vector<32x160xf32>
    %cst_32 = arith.constant dense<0.000000e+00> : vector<8x160xf32>
    %85 = tpu.matmul %82, %84, %cst_32 {dimension_numbers = #tpu.dot_dimension_numbers<[1], [0], [0], [1], [0, 0, 1, 1], [], []>} : vector<8x32xf32>, vector<32x160xf32>, vector<8x160xf32> -> vector<8x160xf32>
    %86 = vector.extract_strided_slice %85 {offsets = [0, 0], sizes = [8, 128], strides = [1, 1]} : vector<8x160xf32> to vector<8x128xf32>
    %87 = vector.extract_strided_slice %62 {offsets = [0, 128], sizes = [8, 32], strides = [1, 1]} : vector<8x192xf32> to vector<8x32xf32>
    %88 = vector.extract_strided_slice %85 {offsets = [0, 128], sizes = [8, 32], strides = [1, 1]} : vector<8x160xf32> to vector<8x32xf32>
    %89 = arith.addf %87, %88 : vector<8x32xf32>
    %90 = arith.negf %89 : vector<8x32xf32>
    %91 = math.exp %90 : vector<8x32xf32>
    %cst_33 = arith.constant 1.000000e+00 : f32
    %92 = vector.broadcast %cst_33 : f32 to vector<8x32xf32>
    %93 = arith.addf %92, %91 : vector<8x32xf32>
    %94 = arith.divf %92, %93 : vector<8x32xf32>
    %95 = arith.mulf %94, %82 : vector<8x32xf32>
    %cst_34 = arith.constant 1.000000e+00 : f32
    %96 = vector.broadcast %cst_34 : f32 to vector<8x32xf32>
    %97 = arith.subf %96, %94 : vector<8x32xf32>
    %98 = vector.extract_strided_slice %62 {offsets = [0, 160], sizes = [8, 32], strides = [1, 1]} : vector<8x192xf32> to vector<8x32xf32>
    %99 = arith.mulf %97, %98 : vector<8x32xf32>
    %100 = arith.addf %95, %99 : vector<8x32xf32>
    %c1_35 = arith.constant 1 : index
    %c0_36 = arith.constant 0 : index
    %c0_37 = arith.constant 0 : index
    %101 = vector.load %arg4[%c1_35, %c0_36, %c0_37] : memref<7x1x128xf32, #tpu.memory_space<vmem>>, vector<1x1x128xf32>
    %102 = vector.shape_cast %101 : vector<1x1x128xf32> to vector<1x128xf32>
    %c1_38 = arith.constant 1 : index
    %c0_39 = arith.constant 0 : index
    %c0_40 = arith.constant 0 : index
    %103 = vector.load %arg2[%c1_38, %c0_39, %c0_40] : memref<7x32x128xf32, #tpu.memory_space<vmem>>, vector<1x32x128xf32>
    %104 = vector.shape_cast %103 : vector<1x32x128xf32> to vector<32x128xf32>
    %cst_41 = arith.constant dense<0.000000e+00> : vector<8x128xf32>
    %105 = tpu.matmul %100, %104, %cst_41 {dimension_numbers = #tpu.dot_dimension_numbers<[1], [0], [0], [1], [0, 0, 1, 1], [], []>} : vector<8x32xf32>, vector<32x128xf32>, vector<8x128xf32> -> vector<8x128xf32>
    %106 = vector.broadcast %102 : vector<1x128xf32> to vector<8x128xf32>
    %107 = arith.addf %105, %106 : vector<8x128xf32>
    %108 = arith.addf %107, %60 : vector<8x128xf32>
    %109 = arith.negf %108 : vector<8x128xf32>
    %110 = math.exp %109 : vector<8x128xf32>
    %cst_42 = arith.constant 1.000000e+00 : f32
    %111 = vector.broadcast %cst_42 : f32 to vector<8x128xf32>
    %112 = arith.addf %111, %110 : vector<8x128xf32>
    %113 = arith.divf %111, %112 : vector<8x128xf32>
    %114 = vector.extract_strided_slice %113 {offsets = [0, 0], sizes = [8, 32], strides = [1, 1]} : vector<8x128xf32> to vector<8x32xf32>
    %115 = vector.extract_strided_slice %113 {offsets = [0, 32], sizes = [8, 32], strides = [1, 1]} : vector<8x128xf32> to vector<8x32xf32>
    %116 = vector.extract_strided_slice %113 {offsets = [0, 64], sizes = [8, 32], strides = [1, 1]} : vector<8x128xf32> to vector<8x32xf32>
    %cst_43 = arith.constant 2.000000e+00 : f32
    %117 = vector.broadcast %cst_43 : f32 to vector<8x32xf32>
    %118 = arith.mulf %117, %116 : vector<8x32xf32>
    %cst_44 = arith.constant 1.000000e+00 : f32
    %119 = vector.broadcast %cst_44 : f32 to vector<8x32xf32>
    %120 = arith.subf %118, %119 : vector<8x32xf32>
    %121 = vector.extract_strided_slice %113 {offsets = [0, 96], sizes = [8, 32], strides = [1, 1]} : vector<8x128xf32> to vector<8x32xf32>
    %122 = arith.mulf %115, %55 : vector<8x32xf32>
    %123 = arith.mulf %114, %120 : vector<8x32xf32>
    %124 = arith.addf %122, %123 : vector<8x32xf32>
    %125 = math.tanh %124 : vector<8x32xf32>
    %126 = arith.mulf %121, %125 : vector<8x32xf32>
    %c1_45 = arith.constant 1 : index
    %c0_46 = arith.constant 0 : index
    %c0_47 = arith.constant 0 : index
    %127 = vector.load %arg3[%c1_45, %c0_46, %c0_47] : memref<7x32x128xf32, #tpu.memory_space<vmem>>, vector<1x32x128xf32>
    %128 = vector.shape_cast %127 : vector<1x32x128xf32> to vector<32x128xf32>
    %cst_48 = arith.constant dense<0.000000e+00> : vector<8x128xf32>
    %129 = tpu.matmul %126, %128, %cst_48 {dimension_numbers = #tpu.dot_dimension_numbers<[1], [0], [0], [1], [0, 0, 1, 1], [], []>} : vector<8x32xf32>, vector<32x128xf32>, vector<8x128xf32> -> vector<8x128xf32>
    %c2 = arith.constant 2 : index
    %c0_49 = arith.constant 0 : index
    %c0_50 = arith.constant 0 : index
    %130 = vector.load %arg0[%c2, %c0_49, %c0_50] : memref<7x8x192xf32, #tpu.memory_space<vmem>>, vector<1x8x192xf32>
    %131 = vector.shape_cast %130 : vector<1x8x192xf32> to vector<8x192xf32>
    %132 = vector.extract_strided_slice %131 {offsets = [0, 0], sizes = [8, 128], strides = [1, 1]} : vector<8x192xf32> to vector<8x128xf32>
    %133 = arith.addf %132, %86 : vector<8x128xf32>
    %134 = arith.negf %133 : vector<8x128xf32>
    %135 = math.exp %134 : vector<8x128xf32>
    %cst_51 = arith.constant 1.000000e+00 : f32
    %136 = vector.broadcast %cst_51 : f32 to vector<8x128xf32>
    %137 = arith.addf %136, %135 : vector<8x128xf32>
    %138 = arith.divf %136, %137 : vector<8x128xf32>
    %139 = vector.extract_strided_slice %138 {offsets = [0, 0], sizes = [8, 32], strides = [1, 1]} : vector<8x128xf32> to vector<8x32xf32>
    %140 = vector.extract_strided_slice %138 {offsets = [0, 32], sizes = [8, 32], strides = [1, 1]} : vector<8x128xf32> to vector<8x32xf32>
    %141 = vector.extract_strided_slice %138 {offsets = [0, 64], sizes = [8, 32], strides = [1, 1]} : vector<8x128xf32> to vector<8x32xf32>
    %cst_52 = arith.constant 2.000000e+00 : f32
    %142 = vector.broadcast %cst_52 : f32 to vector<8x32xf32>
    %143 = arith.mulf %142, %141 : vector<8x32xf32>
    %cst_53 = arith.constant 1.000000e+00 : f32
    %144 = vector.broadcast %cst_53 : f32 to vector<8x32xf32>
    %145 = arith.subf %143, %144 : vector<8x32xf32>
    %146 = vector.extract_strided_slice %138 {offsets = [0, 96], sizes = [8, 32], strides = [1, 1]} : vector<8x128xf32> to vector<8x32xf32>
    %147 = arith.mulf %140, %80 : vector<8x32xf32>
    %148 = arith.mulf %139, %145 : vector<8x32xf32>
    %149 = arith.addf %147, %148 : vector<8x32xf32>
    %150 = math.tanh %149 : vector<8x32xf32>
    %151 = arith.mulf %146, %150 : vector<8x32xf32>
    %c2_54 = arith.constant 2 : index
    %c0_55 = arith.constant 0 : index
    %c0_56 = arith.constant 0 : index
    %152 = vector.load %arg1[%c2_54, %c0_55, %c0_56] : memref<7x32x160xf32, #tpu.memory_space<vmem>>, vector<1x32x160xf32>
    %153 = vector.shape_cast %152 : vector<1x32x160xf32> to vector<32x160xf32>
    %cst_57 = arith.constant dense<0.000000e+00> : vector<8x160xf32>
    %154 = tpu.matmul %151, %153, %cst_57 {dimension_numbers = #tpu.dot_dimension_numbers<[1], [0], [0], [1], [0, 0, 1, 1], [], []>} : vector<8x32xf32>, vector<32x160xf32>, vector<8x160xf32> -> vector<8x160xf32>
    %155 = vector.extract_strided_slice %154 {offsets = [0, 0], sizes = [8, 128], strides = [1, 1]} : vector<8x160xf32> to vector<8x128xf32>
    %156 = vector.extract_strided_slice %131 {offsets = [0, 128], sizes = [8, 32], strides = [1, 1]} : vector<8x192xf32> to vector<8x32xf32>
    %157 = vector.extract_strided_slice %154 {offsets = [0, 128], sizes = [8, 32], strides = [1, 1]} : vector<8x160xf32> to vector<8x32xf32>
    %158 = arith.addf %156, %157 : vector<8x32xf32>
    %159 = arith.negf %158 : vector<8x32xf32>
    %160 = math.exp %159 : vector<8x32xf32>
    %cst_58 = arith.constant 1.000000e+00 : f32
    %161 = vector.broadcast %cst_58 : f32 to vector<8x32xf32>
    %162 = arith.addf %161, %160 : vector<8x32xf32>
    %163 = arith.divf %161, %162 : vector<8x32xf32>
    %164 = arith.mulf %163, %151 : vector<8x32xf32>
    %cst_59 = arith.constant 1.000000e+00 : f32
    %165 = vector.broadcast %cst_59 : f32 to vector<8x32xf32>
    %166 = arith.subf %165, %163 : vector<8x32xf32>
    %167 = vector.extract_strided_slice %131 {offsets = [0, 160], sizes = [8, 32], strides = [1, 1]} : vector<8x192xf32> to vector<8x32xf32>
    %168 = arith.mulf %166, %167 : vector<8x32xf32>
    %169 = arith.addf %164, %168 : vector<8x32xf32>
    %c2_60 = arith.constant 2 : index
    %c0_61 = arith.constant 0 : index
    %c0_62 = arith.constant 0 : index
    %170 = vector.load %arg4[%c2_60, %c0_61, %c0_62] : memref<7x1x128xf32, #tpu.memory_space<vmem>>, vector<1x1x128xf32>
    %171 = vector.shape_cast %170 : vector<1x1x128xf32> to vector<1x128xf32>
    %c2_63 = arith.constant 2 : index
    %c0_64 = arith.constant 0 : index
    %c0_65 = arith.constant 0 : index
    %172 = vector.load %arg2[%c2_63, %c0_64, %c0_65] : memref<7x32x128xf32, #tpu.memory_space<vmem>>, vector<1x32x128xf32>
    %173 = vector.shape_cast %172 : vector<1x32x128xf32> to vector<32x128xf32>
    %cst_66 = arith.constant dense<0.000000e+00> : vector<8x128xf32>
    %174 = tpu.matmul %169, %173, %cst_66 {dimension_numbers = #tpu.dot_dimension_numbers<[1], [0], [0], [1], [0, 0, 1, 1], [], []>} : vector<8x32xf32>, vector<32x128xf32>, vector<8x128xf32> -> vector<8x128xf32>
    %175 = vector.broadcast %171 : vector<1x128xf32> to vector<8x128xf32>
    %176 = arith.addf %174, %175 : vector<8x128xf32>
    %177 = arith.addf %176, %129 : vector<8x128xf32>
    %178 = arith.negf %177 : vector<8x128xf32>
    %179 = math.exp %178 : vector<8x128xf32>
    %cst_67 = arith.constant 1.000000e+00 : f32
    %180 = vector.broadcast %cst_67 : f32 to vector<8x128xf32>
    %181 = arith.addf %180, %179 : vector<8x128xf32>
    %182 = arith.divf %180, %181 : vector<8x128xf32>
    %183 = vector.extract_strided_slice %182 {offsets = [0, 0], sizes = [8, 32], strides = [1, 1]} : vector<8x128xf32> to vector<8x32xf32>
    %184 = vector.extract_strided_slice %182 {offsets = [0, 32], sizes = [8, 32], strides = [1, 1]} : vector<8x128xf32> to vector<8x32xf32>
    %185 = vector.extract_strided_slice %182 {offsets = [0, 64], sizes = [8, 32], strides = [1, 1]} : vector<8x128xf32> to vector<8x32xf32>
    %cst_68 = arith.constant 2.000000e+00 : f32
    %186 = vector.broadcast %cst_68 : f32 to vector<8x32xf32>
    %187 = arith.mulf %186, %185 : vector<8x32xf32>
    %cst_69 = arith.constant 1.000000e+00 : f32
    %188 = vector.broadcast %cst_69 : f32 to vector<8x32xf32>
    %189 = arith.subf %187, %188 : vector<8x32xf32>
    %190 = vector.extract_strided_slice %182 {offsets = [0, 96], sizes = [8, 32], strides = [1, 1]} : vector<8x128xf32> to vector<8x32xf32>
    %191 = arith.mulf %184, %124 : vector<8x32xf32>
    %192 = arith.mulf %183, %189 : vector<8x32xf32>
    %193 = arith.addf %191, %192 : vector<8x32xf32>
    %194 = math.tanh %193 : vector<8x32xf32>
    %195 = arith.mulf %190, %194 : vector<8x32xf32>
    %c2_70 = arith.constant 2 : index
    %c0_71 = arith.constant 0 : index
    %c0_72 = arith.constant 0 : index
    %196 = vector.load %arg3[%c2_70, %c0_71, %c0_72] : memref<7x32x128xf32, #tpu.memory_space<vmem>>, vector<1x32x128xf32>
    %197 = vector.shape_cast %196 : vector<1x32x128xf32> to vector<32x128xf32>
    %cst_73 = arith.constant dense<0.000000e+00> : vector<8x128xf32>
    %198 = tpu.matmul %195, %197, %cst_73 {dimension_numbers = #tpu.dot_dimension_numbers<[1], [0], [0], [1], [0, 0, 1, 1], [], []>} : vector<8x32xf32>, vector<32x128xf32>, vector<8x128xf32> -> vector<8x128xf32>
    %c3 = arith.constant 3 : index
    %c0_74 = arith.constant 0 : index
    %c0_75 = arith.constant 0 : index
    %199 = vector.load %arg0[%c3, %c0_74, %c0_75] : memref<7x8x192xf32, #tpu.memory_space<vmem>>, vector<1x8x192xf32>
    %200 = vector.shape_cast %199 : vector<1x8x192xf32> to vector<8x192xf32>
    %201 = vector.extract_strided_slice %200 {offsets = [0, 0], sizes = [8, 128], strides = [1, 1]} : vector<8x192xf32> to vector<8x128xf32>
    %202 = arith.addf %201, %155 : vector<8x128xf32>
    %203 = arith.negf %202 : vector<8x128xf32>
    %204 = math.exp %203 : vector<8x128xf32>
    %cst_76 = arith.constant 1.000000e+00 : f32
    %205 = vector.broadcast %cst_76 : f32 to vector<8x128xf32>
    %206 = arith.addf %205, %204 : vector<8x128xf32>
    %207 = arith.divf %205, %206 : vector<8x128xf32>
    %208 = vector.extract_strided_slice %207 {offsets = [0, 0], sizes = [8, 32], strides = [1, 1]} : vector<8x128xf32> to vector<8x32xf32>
    %209 = vector.extract_strided_slice %207 {offsets = [0, 32], sizes = [8, 32], strides = [1, 1]} : vector<8x128xf32> to vector<8x32xf32>
    %210 = vector.extract_strided_slice %207 {offsets = [0, 64], sizes = [8, 32], strides = [1, 1]} : vector<8x128xf32> to vector<8x32xf32>
    %cst_77 = arith.constant 2.000000e+00 : f32
    %211 = vector.broadcast %cst_77 : f32 to vector<8x32xf32>
    %212 = arith.mulf %211, %210 : vector<8x32xf32>
    %cst_78 = arith.constant 1.000000e+00 : f32
    %213 = vector.broadcast %cst_78 : f32 to vector<8x32xf32>
    %214 = arith.subf %212, %213 : vector<8x32xf32>
    %215 = vector.extract_strided_slice %207 {offsets = [0, 96], sizes = [8, 32], strides = [1, 1]} : vector<8x128xf32> to vector<8x32xf32>
    %216 = arith.mulf %209, %149 : vector<8x32xf32>
    %217 = arith.mulf %208, %214 : vector<8x32xf32>
    %218 = arith.addf %216, %217 : vector<8x32xf32>
    %219 = math.tanh %218 : vector<8x32xf32>
    %220 = arith.mulf %215, %219 : vector<8x32xf32>
    %c3_79 = arith.constant 3 : index
    %c0_80 = arith.constant 0 : index
    %c0_81 = arith.constant 0 : index
    %221 = vector.load %arg1[%c3_79, %c0_80, %c0_81] : memref<7x32x160xf32, #tpu.memory_space<vmem>>, vector<1x32x160xf32>
    %222 = vector.shape_cast %221 : vector<1x32x160xf32> to vector<32x160xf32>
    %cst_82 = arith.constant dense<0.000000e+00> : vector<8x160xf32>
    %223 = tpu.matmul %220, %222, %cst_82 {dimension_numbers = #tpu.dot_dimension_numbers<[1], [0], [0], [1], [0, 0, 1, 1], [], []>} : vector<8x32xf32>, vector<32x160xf32>, vector<8x160xf32> -> vector<8x160xf32>
    %224 = vector.extract_strided_slice %223 {offsets = [0, 0], sizes = [8, 128], strides = [1, 1]} : vector<8x160xf32> to vector<8x128xf32>
    %225 = vector.extract_strided_slice %200 {offsets = [0, 128], sizes = [8, 32], strides = [1, 1]} : vector<8x192xf32> to vector<8x32xf32>
    %226 = vector.extract_strided_slice %223 {offsets = [0, 128], sizes = [8, 32], strides = [1, 1]} : vector<8x160xf32> to vector<8x32xf32>
    %227 = arith.addf %225, %226 : vector<8x32xf32>
    %228 = arith.negf %227 : vector<8x32xf32>
    %229 = math.exp %228 : vector<8x32xf32>
    %cst_83 = arith.constant 1.000000e+00 : f32
    %230 = vector.broadcast %cst_83 : f32 to vector<8x32xf32>
    %231 = arith.addf %230, %229 : vector<8x32xf32>
    %232 = arith.divf %230, %231 : vector<8x32xf32>
    %233 = arith.mulf %232, %220 : vector<8x32xf32>
    %cst_84 = arith.constant 1.000000e+00 : f32
    %234 = vector.broadcast %cst_84 : f32 to vector<8x32xf32>
    %235 = arith.subf %234, %232 : vector<8x32xf32>
    %236 = vector.extract_strided_slice %200 {offsets = [0, 160], sizes = [8, 32], strides = [1, 1]} : vector<8x192xf32> to vector<8x32xf32>
    %237 = arith.mulf %235, %236 : vector<8x32xf32>
    %238 = arith.addf %233, %237 : vector<8x32xf32>
    %c3_85 = arith.constant 3 : index
    %c0_86 = arith.constant 0 : index
    %c0_87 = arith.constant 0 : index
    %239 = vector.load %arg4[%c3_85, %c0_86, %c0_87] : memref<7x1x128xf32, #tpu.memory_space<vmem>>, vector<1x1x128xf32>
    %240 = vector.shape_cast %239 : vector<1x1x128xf32> to vector<1x128xf32>
    %c3_88 = arith.constant 3 : index
    %c0_89 = arith.constant 0 : index
    %c0_90 = arith.constant 0 : index
    %241 = vector.load %arg2[%c3_88, %c0_89, %c0_90] : memref<7x32x128xf32, #tpu.memory_space<vmem>>, vector<1x32x128xf32>
    %242 = vector.shape_cast %241 : vector<1x32x128xf32> to vector<32x128xf32>
    %cst_91 = arith.constant dense<0.000000e+00> : vector<8x128xf32>
    %243 = tpu.matmul %238, %242, %cst_91 {dimension_numbers = #tpu.dot_dimension_numbers<[1], [0], [0], [1], [0, 0, 1, 1], [], []>} : vector<8x32xf32>, vector<32x128xf32>, vector<8x128xf32> -> vector<8x128xf32>
    %244 = vector.broadcast %240 : vector<1x128xf32> to vector<8x128xf32>
    %245 = arith.addf %243, %244 : vector<8x128xf32>
    %246 = arith.addf %245, %198 : vector<8x128xf32>
    %247 = arith.negf %246 : vector<8x128xf32>
    %248 = math.exp %247 : vector<8x128xf32>
    %cst_92 = arith.constant 1.000000e+00 : f32
    %249 = vector.broadcast %cst_92 : f32 to vector<8x128xf32>
    %250 = arith.addf %249, %248 : vector<8x128xf32>
    %251 = arith.divf %249, %250 : vector<8x128xf32>
    %252 = vector.extract_strided_slice %251 {offsets = [0, 0], sizes = [8, 32], strides = [1, 1]} : vector<8x128xf32> to vector<8x32xf32>
    %253 = vector.extract_strided_slice %251 {offsets = [0, 32], sizes = [8, 32], strides = [1, 1]} : vector<8x128xf32> to vector<8x32xf32>
    %254 = vector.extract_strided_slice %251 {offsets = [0, 64], sizes = [8, 32], strides = [1, 1]} : vector<8x128xf32> to vector<8x32xf32>
    %cst_93 = arith.constant 2.000000e+00 : f32
    %255 = vector.broadcast %cst_93 : f32 to vector<8x32xf32>
    %256 = arith.mulf %255, %254 : vector<8x32xf32>
    %cst_94 = arith.constant 1.000000e+00 : f32
    %257 = vector.broadcast %cst_94 : f32 to vector<8x32xf32>
    %258 = arith.subf %256, %257 : vector<8x32xf32>
    %259 = vector.extract_strided_slice %251 {offsets = [0, 96], sizes = [8, 32], strides = [1, 1]} : vector<8x128xf32> to vector<8x32xf32>
    %260 = arith.mulf %253, %193 : vector<8x32xf32>
    %261 = arith.mulf %252, %258 : vector<8x32xf32>
    %262 = arith.addf %260, %261 : vector<8x32xf32>
    %263 = math.tanh %262 : vector<8x32xf32>
    %264 = arith.mulf %259, %263 : vector<8x32xf32>
    %c3_95 = arith.constant 3 : index
    %c0_96 = arith.constant 0 : index
    %c0_97 = arith.constant 0 : index
    %265 = vector.load %arg3[%c3_95, %c0_96, %c0_97] : memref<7x32x128xf32, #tpu.memory_space<vmem>>, vector<1x32x128xf32>
    %266 = vector.shape_cast %265 : vector<1x32x128xf32> to vector<32x128xf32>
    %cst_98 = arith.constant dense<0.000000e+00> : vector<8x128xf32>
    %267 = tpu.matmul %264, %266, %cst_98 {dimension_numbers = #tpu.dot_dimension_numbers<[1], [0], [0], [1], [0, 0, 1, 1], [], []>} : vector<8x32xf32>, vector<32x128xf32>, vector<8x128xf32> -> vector<8x128xf32>
    %c4 = arith.constant 4 : index
    %c0_99 = arith.constant 0 : index
    %c0_100 = arith.constant 0 : index
    %268 = vector.load %arg0[%c4, %c0_99, %c0_100] : memref<7x8x192xf32, #tpu.memory_space<vmem>>, vector<1x8x192xf32>
    %269 = vector.shape_cast %268 : vector<1x8x192xf32> to vector<8x192xf32>
    %270 = vector.extract_strided_slice %269 {offsets = [0, 0], sizes = [8, 128], strides = [1, 1]} : vector<8x192xf32> to vector<8x128xf32>
    %271 = arith.addf %270, %224 : vector<8x128xf32>
    %272 = arith.negf %271 : vector<8x128xf32>
    %273 = math.exp %272 : vector<8x128xf32>
    %cst_101 = arith.constant 1.000000e+00 : f32
    %274 = vector.broadcast %cst_101 : f32 to vector<8x128xf32>
    %275 = arith.addf %274, %273 : vector<8x128xf32>
    %276 = arith.divf %274, %275 : vector<8x128xf32>
    %277 = vector.extract_strided_slice %276 {offsets = [0, 0], sizes = [8, 32], strides = [1, 1]} : vector<8x128xf32> to vector<8x32xf32>
    %278 = vector.extract_strided_slice %276 {offsets = [0, 32], sizes = [8, 32], strides = [1, 1]} : vector<8x128xf32> to vector<8x32xf32>
    %279 = vector.extract_strided_slice %276 {offsets = [0, 64], sizes = [8, 32], strides = [1, 1]} : vector<8x128xf32> to vector<8x32xf32>
    %cst_102 = arith.constant 2.000000e+00 : f32
    %280 = vector.broadcast %cst_102 : f32 to vector<8x32xf32>
    %281 = arith.mulf %280, %279 : vector<8x32xf32>
    %cst_103 = arith.constant 1.000000e+00 : f32
    %282 = vector.broadcast %cst_103 : f32 to vector<8x32xf32>
    %283 = arith.subf %281, %282 : vector<8x32xf32>
    %284 = vector.extract_strided_slice %276 {offsets = [0, 96], sizes = [8, 32], strides = [1, 1]} : vector<8x128xf32> to vector<8x32xf32>
    %285 = arith.mulf %278, %218 : vector<8x32xf32>
    %286 = arith.mulf %277, %283 : vector<8x32xf32>
    %287 = arith.addf %285, %286 : vector<8x32xf32>
    %288 = math.tanh %287 : vector<8x32xf32>
    %289 = arith.mulf %284, %288 : vector<8x32xf32>
    %c4_104 = arith.constant 4 : index
    %c0_105 = arith.constant 0 : index
    %c0_106 = arith.constant 0 : index
    %290 = vector.load %arg1[%c4_104, %c0_105, %c0_106] : memref<7x32x160xf32, #tpu.memory_space<vmem>>, vector<1x32x160xf32>
    %291 = vector.shape_cast %290 : vector<1x32x160xf32> to vector<32x160xf32>
    %cst_107 = arith.constant dense<0.000000e+00> : vector<8x160xf32>
    %292 = tpu.matmul %289, %291, %cst_107 {dimension_numbers = #tpu.dot_dimension_numbers<[1], [0], [0], [1], [0, 0, 1, 1], [], []>} : vector<8x32xf32>, vector<32x160xf32>, vector<8x160xf32> -> vector<8x160xf32>
    %293 = vector.extract_strided_slice %292 {offsets = [0, 0], sizes = [8, 128], strides = [1, 1]} : vector<8x160xf32> to vector<8x128xf32>
    %294 = vector.extract_strided_slice %269 {offsets = [0, 128], sizes = [8, 32], strides = [1, 1]} : vector<8x192xf32> to vector<8x32xf32>
    %295 = vector.extract_strided_slice %292 {offsets = [0, 128], sizes = [8, 32], strides = [1, 1]} : vector<8x160xf32> to vector<8x32xf32>
    %296 = arith.addf %294, %295 : vector<8x32xf32>
    %297 = arith.negf %296 : vector<8x32xf32>
    %298 = math.exp %297 : vector<8x32xf32>
    %cst_108 = arith.constant 1.000000e+00 : f32
    %299 = vector.broadcast %cst_108 : f32 to vector<8x32xf32>
    %300 = arith.addf %299, %298 : vector<8x32xf32>
    %301 = arith.divf %299, %300 : vector<8x32xf32>
    %302 = arith.mulf %301, %289 : vector<8x32xf32>
    %cst_109 = arith.constant 1.000000e+00 : f32
    %303 = vector.broadcast %cst_109 : f32 to vector<8x32xf32>
    %304 = arith.subf %303, %301 : vector<8x32xf32>
    %305 = vector.extract_strided_slice %269 {offsets = [0, 160], sizes = [8, 32], strides = [1, 1]} : vector<8x192xf32> to vector<8x32xf32>
    %306 = arith.mulf %304, %305 : vector<8x32xf32>
    %307 = arith.addf %302, %306 : vector<8x32xf32>
    %c4_110 = arith.constant 4 : index
    %c0_111 = arith.constant 0 : index
    %c0_112 = arith.constant 0 : index
    %308 = vector.load %arg4[%c4_110, %c0_111, %c0_112] : memref<7x1x128xf32, #tpu.memory_space<vmem>>, vector<1x1x128xf32>
    %309 = vector.shape_cast %308 : vector<1x1x128xf32> to vector<1x128xf32>
    %c4_113 = arith.constant 4 : index
    %c0_114 = arith.constant 0 : index
    %c0_115 = arith.constant 0 : index
    %310 = vector.load %arg2[%c4_113, %c0_114, %c0_115] : memref<7x32x128xf32, #tpu.memory_space<vmem>>, vector<1x32x128xf32>
    %311 = vector.shape_cast %310 : vector<1x32x128xf32> to vector<32x128xf32>
    %cst_116 = arith.constant dense<0.000000e+00> : vector<8x128xf32>
    %312 = tpu.matmul %307, %311, %cst_116 {dimension_numbers = #tpu.dot_dimension_numbers<[1], [0], [0], [1], [0, 0, 1, 1], [], []>} : vector<8x32xf32>, vector<32x128xf32>, vector<8x128xf32> -> vector<8x128xf32>
    %313 = vector.broadcast %309 : vector<1x128xf32> to vector<8x128xf32>
    %314 = arith.addf %312, %313 : vector<8x128xf32>
    %315 = arith.addf %314, %267 : vector<8x128xf32>
    %316 = arith.negf %315 : vector<8x128xf32>
    %317 = math.exp %316 : vector<8x128xf32>
    %cst_117 = arith.constant 1.000000e+00 : f32
    %318 = vector.broadcast %cst_117 : f32 to vector<8x128xf32>
    %319 = arith.addf %318, %317 : vector<8x128xf32>
    %320 = arith.divf %318, %319 : vector<8x128xf32>
    %321 = vector.extract_strided_slice %320 {offsets = [0, 0], sizes = [8, 32], strides = [1, 1]} : vector<8x128xf32> to vector<8x32xf32>
    %322 = vector.extract_strided_slice %320 {offsets = [0, 32], sizes = [8, 32], strides = [1, 1]} : vector<8x128xf32> to vector<8x32xf32>
    %323 = vector.extract_strided_slice %320 {offsets = [0, 64], sizes = [8, 32], strides = [1, 1]} : vector<8x128xf32> to vector<8x32xf32>
    %cst_118 = arith.constant 2.000000e+00 : f32
    %324 = vector.broadcast %cst_118 : f32 to vector<8x32xf32>
    %325 = arith.mulf %324, %323 : vector<8x32xf32>
    %cst_119 = arith.constant 1.000000e+00 : f32
    %326 = vector.broadcast %cst_119 : f32 to vector<8x32xf32>
    %327 = arith.subf %325, %326 : vector<8x32xf32>
    %328 = vector.extract_strided_slice %320 {offsets = [0, 96], sizes = [8, 32], strides = [1, 1]} : vector<8x128xf32> to vector<8x32xf32>
    %329 = arith.mulf %322, %262 : vector<8x32xf32>
    %330 = arith.mulf %321, %327 : vector<8x32xf32>
    %331 = arith.addf %329, %330 : vector<8x32xf32>
    %332 = math.tanh %331 : vector<8x32xf32>
    %333 = arith.mulf %328, %332 : vector<8x32xf32>
    %c4_120 = arith.constant 4 : index
    %c0_121 = arith.constant 0 : index
    %c0_122 = arith.constant 0 : index
    %334 = vector.load %arg3[%c4_120, %c0_121, %c0_122] : memref<7x32x128xf32, #tpu.memory_space<vmem>>, vector<1x32x128xf32>
    %335 = vector.shape_cast %334 : vector<1x32x128xf32> to vector<32x128xf32>
    %cst_123 = arith.constant dense<0.000000e+00> : vector<8x128xf32>
    %336 = tpu.matmul %333, %335, %cst_123 {dimension_numbers = #tpu.dot_dimension_numbers<[1], [0], [0], [1], [0, 0, 1, 1], [], []>} : vector<8x32xf32>, vector<32x128xf32>, vector<8x128xf32> -> vector<8x128xf32>
    %c5 = arith.constant 5 : index
    %c0_124 = arith.constant 0 : index
    %c0_125 = arith.constant 0 : index
    %337 = vector.load %arg0[%c5, %c0_124, %c0_125] : memref<7x8x192xf32, #tpu.memory_space<vmem>>, vector<1x8x192xf32>
    %338 = vector.shape_cast %337 : vector<1x8x192xf32> to vector<8x192xf32>
    %339 = vector.extract_strided_slice %338 {offsets = [0, 0], sizes = [8, 128], strides = [1, 1]} : vector<8x192xf32> to vector<8x128xf32>
    %340 = arith.addf %339, %293 : vector<8x128xf32>
    %341 = arith.negf %340 : vector<8x128xf32>
    %342 = math.exp %341 : vector<8x128xf32>
    %cst_126 = arith.constant 1.000000e+00 : f32
    %343 = vector.broadcast %cst_126 : f32 to vector<8x128xf32>
    %344 = arith.addf %343, %342 : vector<8x128xf32>
    %345 = arith.divf %343, %344 : vector<8x128xf32>
    %346 = vector.extract_strided_slice %345 {offsets = [0, 0], sizes = [8, 32], strides = [1, 1]} : vector<8x128xf32> to vector<8x32xf32>
    %347 = vector.extract_strided_slice %345 {offsets = [0, 32], sizes = [8, 32], strides = [1, 1]} : vector<8x128xf32> to vector<8x32xf32>
    %348 = vector.extract_strided_slice %345 {offsets = [0, 64], sizes = [8, 32], strides = [1, 1]} : vector<8x128xf32> to vector<8x32xf32>
    %cst_127 = arith.constant 2.000000e+00 : f32
    %349 = vector.broadcast %cst_127 : f32 to vector<8x32xf32>
    %350 = arith.mulf %349, %348 : vector<8x32xf32>
    %cst_128 = arith.constant 1.000000e+00 : f32
    %351 = vector.broadcast %cst_128 : f32 to vector<8x32xf32>
    %352 = arith.subf %350, %351 : vector<8x32xf32>
    %353 = vector.extract_strided_slice %345 {offsets = [0, 96], sizes = [8, 32], strides = [1, 1]} : vector<8x128xf32> to vector<8x32xf32>
    %354 = arith.mulf %347, %287 : vector<8x32xf32>
    %355 = arith.mulf %346, %352 : vector<8x32xf32>
    %356 = arith.addf %354, %355 : vector<8x32xf32>
    %357 = math.tanh %356 : vector<8x32xf32>
    %358 = arith.mulf %353, %357 : vector<8x32xf32>
    %c5_129 = arith.constant 5 : index
    %c0_130 = arith.constant 0 : index
    %c0_131 = arith.constant 0 : index
    %359 = vector.load %arg1[%c5_129, %c0_130, %c0_131] : memref<7x32x160xf32, #tpu.memory_space<vmem>>, vector<1x32x160xf32>
    %360 = vector.shape_cast %359 : vector<1x32x160xf32> to vector<32x160xf32>
    %cst_132 = arith.constant dense<0.000000e+00> : vector<8x160xf32>
    %361 = tpu.matmul %358, %360, %cst_132 {dimension_numbers = #tpu.dot_dimension_numbers<[1], [0], [0], [1], [0, 0, 1, 1], [], []>} : vector<8x32xf32>, vector<32x160xf32>, vector<8x160xf32> -> vector<8x160xf32>
    %362 = vector.extract_strided_slice %361 {offsets = [0, 0], sizes = [8, 128], strides = [1, 1]} : vector<8x160xf32> to vector<8x128xf32>
    %363 = vector.extract_strided_slice %338 {offsets = [0, 128], sizes = [8, 32], strides = [1, 1]} : vector<8x192xf32> to vector<8x32xf32>
    %364 = vector.extract_strided_slice %361 {offsets = [0, 128], sizes = [8, 32], strides = [1, 1]} : vector<8x160xf32> to vector<8x32xf32>
    %365 = arith.addf %363, %364 : vector<8x32xf32>
    %366 = arith.negf %365 : vector<8x32xf32>
    %367 = math.exp %366 : vector<8x32xf32>
    %cst_133 = arith.constant 1.000000e+00 : f32
    %368 = vector.broadcast %cst_133 : f32 to vector<8x32xf32>
    %369 = arith.addf %368, %367 : vector<8x32xf32>
    %370 = arith.divf %368, %369 : vector<8x32xf32>
    %371 = arith.mulf %370, %358 : vector<8x32xf32>
    %cst_134 = arith.constant 1.000000e+00 : f32
    %372 = vector.broadcast %cst_134 : f32 to vector<8x32xf32>
    %373 = arith.subf %372, %370 : vector<8x32xf32>
    %374 = vector.extract_strided_slice %338 {offsets = [0, 160], sizes = [8, 32], strides = [1, 1]} : vector<8x192xf32> to vector<8x32xf32>
    %375 = arith.mulf %373, %374 : vector<8x32xf32>
    %376 = arith.addf %371, %375 : vector<8x32xf32>
    %c5_135 = arith.constant 5 : index
    %c0_136 = arith.constant 0 : index
    %c0_137 = arith.constant 0 : index
    %377 = vector.load %arg4[%c5_135, %c0_136, %c0_137] : memref<7x1x128xf32, #tpu.memory_space<vmem>>, vector<1x1x128xf32>
    %378 = vector.shape_cast %377 : vector<1x1x128xf32> to vector<1x128xf32>
    %c5_138 = arith.constant 5 : index
    %c0_139 = arith.constant 0 : index
    %c0_140 = arith.constant 0 : index
    %379 = vector.load %arg2[%c5_138, %c0_139, %c0_140] : memref<7x32x128xf32, #tpu.memory_space<vmem>>, vector<1x32x128xf32>
    %380 = vector.shape_cast %379 : vector<1x32x128xf32> to vector<32x128xf32>
    %cst_141 = arith.constant dense<0.000000e+00> : vector<8x128xf32>
    %381 = tpu.matmul %376, %380, %cst_141 {dimension_numbers = #tpu.dot_dimension_numbers<[1], [0], [0], [1], [0, 0, 1, 1], [], []>} : vector<8x32xf32>, vector<32x128xf32>, vector<8x128xf32> -> vector<8x128xf32>
    %382 = vector.broadcast %378 : vector<1x128xf32> to vector<8x128xf32>
    %383 = arith.addf %381, %382 : vector<8x128xf32>
    %384 = arith.addf %383, %336 : vector<8x128xf32>
    %385 = arith.negf %384 : vector<8x128xf32>
    %386 = math.exp %385 : vector<8x128xf32>
    %cst_142 = arith.constant 1.000000e+00 : f32
    %387 = vector.broadcast %cst_142 : f32 to vector<8x128xf32>
    %388 = arith.addf %387, %386 : vector<8x128xf32>
    %389 = arith.divf %387, %388 : vector<8x128xf32>
    %390 = vector.extract_strided_slice %389 {offsets = [0, 0], sizes = [8, 32], strides = [1, 1]} : vector<8x128xf32> to vector<8x32xf32>
    %391 = vector.extract_strided_slice %389 {offsets = [0, 32], sizes = [8, 32], strides = [1, 1]} : vector<8x128xf32> to vector<8x32xf32>
    %392 = vector.extract_strided_slice %389 {offsets = [0, 64], sizes = [8, 32], strides = [1, 1]} : vector<8x128xf32> to vector<8x32xf32>
    %cst_143 = arith.constant 2.000000e+00 : f32
    %393 = vector.broadcast %cst_143 : f32 to vector<8x32xf32>
    %394 = arith.mulf %393, %392 : vector<8x32xf32>
    %cst_144 = arith.constant 1.000000e+00 : f32
    %395 = vector.broadcast %cst_144 : f32 to vector<8x32xf32>
    %396 = arith.subf %394, %395 : vector<8x32xf32>
    %397 = vector.extract_strided_slice %389 {offsets = [0, 96], sizes = [8, 32], strides = [1, 1]} : vector<8x128xf32> to vector<8x32xf32>
    %398 = arith.mulf %391, %331 : vector<8x32xf32>
    %399 = arith.mulf %390, %396 : vector<8x32xf32>
    %400 = arith.addf %398, %399 : vector<8x32xf32>
    %401 = math.tanh %400 : vector<8x32xf32>
    %402 = arith.mulf %397, %401 : vector<8x32xf32>
    %c5_145 = arith.constant 5 : index
    %c0_146 = arith.constant 0 : index
    %c0_147 = arith.constant 0 : index
    %403 = vector.load %arg3[%c5_145, %c0_146, %c0_147] : memref<7x32x128xf32, #tpu.memory_space<vmem>>, vector<1x32x128xf32>
    %404 = vector.shape_cast %403 : vector<1x32x128xf32> to vector<32x128xf32>
    %cst_148 = arith.constant dense<0.000000e+00> : vector<8x128xf32>
    %405 = tpu.matmul %402, %404, %cst_148 {dimension_numbers = #tpu.dot_dimension_numbers<[1], [0], [0], [1], [0, 0, 1, 1], [], []>} : vector<8x32xf32>, vector<32x128xf32>, vector<8x128xf32> -> vector<8x128xf32>
    %c6 = arith.constant 6 : index
    %c0_149 = arith.constant 0 : index
    %c0_150 = arith.constant 0 : index
    %406 = vector.load %arg0[%c6, %c0_149, %c0_150] : memref<7x8x192xf32, #tpu.memory_space<vmem>>, vector<1x8x192xf32>
    %407 = vector.shape_cast %406 : vector<1x8x192xf32> to vector<8x192xf32>
    %408 = vector.extract_strided_slice %407 {offsets = [0, 0], sizes = [8, 128], strides = [1, 1]} : vector<8x192xf32> to vector<8x128xf32>
    %409 = arith.addf %408, %362 : vector<8x128xf32>
    %410 = arith.negf %409 : vector<8x128xf32>
    %411 = math.exp %410 : vector<8x128xf32>
    %cst_151 = arith.constant 1.000000e+00 : f32
    %412 = vector.broadcast %cst_151 : f32 to vector<8x128xf32>
    %413 = arith.addf %412, %411 : vector<8x128xf32>
    %414 = arith.divf %412, %413 : vector<8x128xf32>
    %415 = vector.extract_strided_slice %414 {offsets = [0, 0], sizes = [8, 32], strides = [1, 1]} : vector<8x128xf32> to vector<8x32xf32>
    %416 = vector.extract_strided_slice %414 {offsets = [0, 32], sizes = [8, 32], strides = [1, 1]} : vector<8x128xf32> to vector<8x32xf32>
    %417 = vector.extract_strided_slice %414 {offsets = [0, 64], sizes = [8, 32], strides = [1, 1]} : vector<8x128xf32> to vector<8x32xf32>
    %cst_152 = arith.constant 2.000000e+00 : f32
    %418 = vector.broadcast %cst_152 : f32 to vector<8x32xf32>
    %419 = arith.mulf %418, %417 : vector<8x32xf32>
    %cst_153 = arith.constant 1.000000e+00 : f32
    %420 = vector.broadcast %cst_153 : f32 to vector<8x32xf32>
    %421 = arith.subf %419, %420 : vector<8x32xf32>
    %422 = vector.extract_strided_slice %414 {offsets = [0, 96], sizes = [8, 32], strides = [1, 1]} : vector<8x128xf32> to vector<8x32xf32>
    %423 = arith.mulf %416, %356 : vector<8x32xf32>
    %424 = arith.mulf %415, %421 : vector<8x32xf32>
    %425 = arith.addf %423, %424 : vector<8x32xf32>
    %426 = math.tanh %425 : vector<8x32xf32>
    %427 = arith.mulf %422, %426 : vector<8x32xf32>
    %c6_154 = arith.constant 6 : index
    %c0_155 = arith.constant 0 : index
    %c0_156 = arith.constant 0 : index
    %428 = vector.load %arg1[%c6_154, %c0_155, %c0_156] : memref<7x32x160xf32, #tpu.memory_space<vmem>>, vector<1x32x160xf32>
    %429 = vector.shape_cast %428 : vector<1x32x160xf32> to vector<32x160xf32>
    %cst_157 = arith.constant dense<0.000000e+00> : vector<8x160xf32>
    %430 = tpu.matmul %427, %429, %cst_157 {dimension_numbers = #tpu.dot_dimension_numbers<[1], [0], [0], [1], [0, 0, 1, 1], [], []>} : vector<8x32xf32>, vector<32x160xf32>, vector<8x160xf32> -> vector<8x160xf32>
    %431 = vector.extract_strided_slice %407 {offsets = [0, 128], sizes = [8, 32], strides = [1, 1]} : vector<8x192xf32> to vector<8x32xf32>
    %432 = vector.extract_strided_slice %430 {offsets = [0, 128], sizes = [8, 32], strides = [1, 1]} : vector<8x160xf32> to vector<8x32xf32>
    %433 = arith.addf %431, %432 : vector<8x32xf32>
    %434 = arith.negf %433 : vector<8x32xf32>
    %435 = math.exp %434 : vector<8x32xf32>
    %cst_158 = arith.constant 1.000000e+00 : f32
    %436 = vector.broadcast %cst_158 : f32 to vector<8x32xf32>
    %437 = arith.addf %436, %435 : vector<8x32xf32>
    %438 = arith.divf %436, %437 : vector<8x32xf32>
    %439 = arith.mulf %438, %427 : vector<8x32xf32>
    %cst_159 = arith.constant 1.000000e+00 : f32
    %440 = vector.broadcast %cst_159 : f32 to vector<8x32xf32>
    %441 = arith.subf %440, %438 : vector<8x32xf32>
    %442 = vector.extract_strided_slice %407 {offsets = [0, 160], sizes = [8, 32], strides = [1, 1]} : vector<8x192xf32> to vector<8x32xf32>
    %443 = arith.mulf %441, %442 : vector<8x32xf32>
    %444 = arith.addf %439, %443 : vector<8x32xf32>
    %c6_160 = arith.constant 6 : index
    %c0_161 = arith.constant 0 : index
    %c0_162 = arith.constant 0 : index
    %445 = vector.load %arg4[%c6_160, %c0_161, %c0_162] : memref<7x1x128xf32, #tpu.memory_space<vmem>>, vector<1x1x128xf32>
    %446 = vector.shape_cast %445 : vector<1x1x128xf32> to vector<1x128xf32>
    %c6_163 = arith.constant 6 : index
    %c0_164 = arith.constant 0 : index
    %c0_165 = arith.constant 0 : index
    %447 = vector.load %arg2[%c6_163, %c0_164, %c0_165] : memref<7x32x128xf32, #tpu.memory_space<vmem>>, vector<1x32x128xf32>
    %448 = vector.shape_cast %447 : vector<1x32x128xf32> to vector<32x128xf32>
    %cst_166 = arith.constant dense<0.000000e+00> : vector<8x128xf32>
    %449 = tpu.matmul %444, %448, %cst_166 {dimension_numbers = #tpu.dot_dimension_numbers<[1], [0], [0], [1], [0, 0, 1, 1], [], []>} : vector<8x32xf32>, vector<32x128xf32>, vector<8x128xf32> -> vector<8x128xf32>
    %450 = vector.broadcast %446 : vector<1x128xf32> to vector<8x128xf32>
    %451 = arith.addf %449, %450 : vector<8x128xf32>
    %452 = arith.addf %451, %405 : vector<8x128xf32>
    %453 = arith.negf %452 : vector<8x128xf32>
    %454 = math.exp %453 : vector<8x128xf32>
    %cst_167 = arith.constant 1.000000e+00 : f32
    %455 = vector.broadcast %cst_167 : f32 to vector<8x128xf32>
    %456 = arith.addf %455, %454 : vector<8x128xf32>
    %457 = arith.divf %455, %456 : vector<8x128xf32>
    %458 = vector.extract_strided_slice %457 {offsets = [0, 0], sizes = [8, 32], strides = [1, 1]} : vector<8x128xf32> to vector<8x32xf32>
    %459 = vector.extract_strided_slice %457 {offsets = [0, 32], sizes = [8, 32], strides = [1, 1]} : vector<8x128xf32> to vector<8x32xf32>
    %460 = vector.extract_strided_slice %457 {offsets = [0, 64], sizes = [8, 32], strides = [1, 1]} : vector<8x128xf32> to vector<8x32xf32>
    %cst_168 = arith.constant 2.000000e+00 : f32
    %461 = vector.broadcast %cst_168 : f32 to vector<8x32xf32>
    %462 = arith.mulf %461, %460 : vector<8x32xf32>
    %cst_169 = arith.constant 1.000000e+00 : f32
    %463 = vector.broadcast %cst_169 : f32 to vector<8x32xf32>
    %464 = arith.subf %462, %463 : vector<8x32xf32>
    %465 = vector.extract_strided_slice %457 {offsets = [0, 96], sizes = [8, 32], strides = [1, 1]} : vector<8x128xf32> to vector<8x32xf32>
    %466 = arith.mulf %459, %400 : vector<8x32xf32>
    %467 = arith.mulf %458, %464 : vector<8x32xf32>
    %468 = arith.addf %466, %467 : vector<8x32xf32>
    %469 = math.tanh %468 : vector<8x32xf32>
    %470 = arith.mulf %465, %469 : vector<8x32xf32>
    %c0_170 = arith.constant 0 : index
    %c0_171 = arith.constant 0 : index
    %471 = vector.load %arg5[%c0_170, %c0_171] : memref<8x32xf32, #tpu.memory_space<vmem>>, vector<8x32xf32>
    tpu.vector_store %arg5[%c0_170, %c0_171], %470 {strides = array<i32>} : memref<8x32xf32, #tpu.memory_space<vmem>>, vector<8x32xf32>,
    return
  }
}

</mosaic_0001>

<bundles_post_ra>
// kernel: slot_sequence_encode.1
= control target key start
LH: loop header
LB: loop body
LE: loop exit
PB: predicated region body
PF: predicated region fallthrough
CT: control target
= control target key end

     0   :  { %10 = vsyncpa [#allocation3], 0  ;;  %s2443_s0 = inlined_call_operand.vmem [shape: f32[7,8,192], index: 0, kind: input, shape index: {}]   ;;  %s2444_s1 = inlined_call_operand.vmem [shape: f32[7,32,160], index: 1, kind: input, shape index: {}]   ;;  %s2445_s2 = inlined_call_operand.vmem [shape: f32[7,32,128], index: 2, kind: input, shape index: {}]   ;;  %s2446_s3 = inlined_call_operand.hbm [shape: f32[7,32,128], index: 3, kind: input, shape index: {}]   ;;  %s2447_s4 = inlined_call_operand.vmem [shape: f32[7,1,128], index: 4, kind: input, shape index: {}]   ;;  %s2448_s5 = inlined_call_operand.hbm [shape: f32[8,32], index: 5, kind: output, shape index: {}]  }
   0x1   :  { %11 = vsyncpa [#allocation4], 0  ;;  %s22_s20 = sshll.u32 %s2446_s3, 4  ;;  %s1909_s21 = smov [#allocation2]   ;;  %s23_s20 = int_to_ptr.hbm [resolvable:$true] %s22_s20 }
   0x2   :  { %s24_s22 = sshll.u32 %s1909_s21, 4  ;;  %s1910_s23 = smov 128   ;;  %s25_s22 = int_to_ptr.vmem [resolvable:$true] %s24_s22 }
   0x3   :  { %s1911_s24 = smov 8  }
   0x4   :  { %30 = dma.hbm_to_vmem [thread:$0]  %s23_s20, 3584, %s25_s22, [#allocation3], %s1910_s23, %s1910_s23, %s1911_s24  }
   0x5   :  { %1905 = dma.done.wait [#allocation3], 3584  }
   0x6   :  { %1906 = vsyncadd [#allocation3], 4294963712  ;;  %v37_v0 = vld [vmem:[%s2443_s0] sm:$0xff]  ;;  %s1912_s3 = smov 64   ;;  %s1913_s27 = smov 96   ;;  %v77_v19 = vld [vmem:[%s2444_s1 + $0x30] sm:$0xff] }
   0x7   :  { %v1584_v1 = vmul.f32 -1.442695, %v37_v0  ;;  %v78_v20 = vld [vmem:[%s2444_s1 + $0x38] sm:$0xff]  ;;  %v75_v21 = vld [vmem:[%s2444_s1 + $0x20] sm:$0xff]  ;;  %97 = vmatpush.msra.mxu0 %v77_v19  ;;  %v76_v22 = vld [vmem:[%s2444_s1 + $0x28] sm:$0xff]  ;;  %s1914_s19 = smov 32  }
   0x8   :  { %117 = vmatpush.msra.mxu1 %v78_v20  ;;  %v73_v23 = vld [vmem:[%s2444_s1 + $0x10] sm:$0xff]  ;;  %v74_v24 = vld [vmem:[%s2444_s1 + $0x18] sm:$0xff]  ;;  %v71_v25 = vld [vmem:[%s2444_s1] sm:$0xff]  ;;  %vm82_vm4 = vcmask 261120   ;;  %s1574_s18 = sshll.u32 %s2448_s5, 4  ;;  %s1575_s18 = int_to_ptr.hbm [resolvable:$true] %s1574_s18 }
   0x9   :  { %1745 = vpow2.f32 %v1584_v1  ;;  %98 = vmatpush.msra.mxu0 %v75_v21  ;;  %v72_v26 = vld [vmem:[%s2444_s1 + $0x8] sm:$0xff]  ;;  %v158_v31 = vld [vmem:[%s2445_s2 + $0x18] sm:$0xff]  ;;  %v157_v32 = vld [vmem:[%s2445_s2 + $0x10] sm:$0xff] }
   0xa   :  { %118 = vmatpush.msra.mxu1 %v76_v22  ;;  %v38_v29 = vld [vmem:[%s2443_s0 + $0x8] sm:$0xff]  ;;  %177 = vmatpush.msra.mxu2 %v158_v31  ;;  %v1593_v33 = vld [vmem:[%s2443_s0 + $0x10] sm:$0xff]  ;;  %v155_v41 = vld [vmem:[%s2445_s2] sm:$0xff] }
   0xb   :  { %99 = vmatpush.msra.mxu0 %v73_v23  ;;  %v156_v38 = vld [vmem:[%s2445_s2 + $0x8] sm:$0xff] }
   0xc   :  { %119 = vmatpush.msra.mxu1 %v74_v24  ;;  %178 = vmatpush.msra.mxu2 %v157_v32 }
   0xd   :  { %100 = vmatpush.msra.mxu0 %v71_v25 }
   0xe   :  { %120 = vmatpush.msra.mxu1 %v72_v26  ;;  %179 = vmatpush.msra.mxu2 %v156_v38 }
   0xf   :  { %v1746_v2 = vpop.eup %1745 }
  0x10   :  { %v42_v3 = vadd.f32 1.0, %v1746_v2  ;;  %180 = vmatpush.msra.mxu2 %v155_v41  ;;  %v1601_v41 = vld [vmem:[%s2444_s1 + $0x60] sm:$0xff] }
  0x12   :  { %1747 = vrcp.f32 %v42_v3  ;;  %v54_v6 = vand.u32 2147483648, %v42_v3  ;;  %vm48_vm0 = vweird.f32 %v42_v3  ;;  %v52_v8 = vand.u32 2147483647, %v42_v3 }
  0x14   :  { %v55_v10 = vor.u32 1.1754944e-38, %v54_v6  ;;  %vm53_vm3 = vcmp.eq.f32.partialorder %v52_v8, 8.507059e+37 }
  0x18   :  { %v1748_v4 = vpop.eup %1747 }
  0x19   :  { %v44_v5 = vmul.f32 %v1748_v4, %v42_v3  ;;  %vm49_vm1 = vweird.f32 %v1748_v4 }
  0x1a   :  { %vm50_vm2 = vmor %vm48_vm0, %vm49_vm1 }
  0x1b   :  { %v45_v7 = vsub.f32 1.0, %v44_v5 }
  0x1d   :  { %v46_v9 = vmul.f32 %v1748_v4, %v45_v7 }
  0x1f   :  { %v47_v11 = vadd.f32 %v1748_v4, %v46_v9 }
  0x21   :  { %v51_v12 = vsel %vm50_vm2, %v1748_v4, %v47_v11  ;;  %v1738_v11 = vld [vmem:[%s2447_s4] ss:$0 sm:$0xff] }
  0x22   :  { %v56_v13 = vsel %vm53_vm3, %v55_v10, %v51_v12 }
  0x23   :  { %v58_v14 = vmul.f32 2.0, %v56_v13 }
  0x25   :  { %v1585_v15 = vadd.f32 -1.0, %v58_v14 }
  0x27   :  { %61 = vrot.lane.b32.xlu0 %v1585_v15, %s1912_s3 }
  0x99   :  { %v62_v16 = vpop.permute.xlu0 %61 }
  0x9a   :  { %v1953_v17 = vmul.f32 %v62_v16, %v56_v13 }
  0x9c   :  { %1749 = vtanh.f32 %v1953_v17 }
  0xa2   :  { %v1750_v18 = vpop.eup %1749 }
  0xa3   :  { %67 = vrot.lane.b32.xlu0 %v1750_v18, %s1913_s27 }
 0x115   :  { %v68_v27 = vpop.permute.xlu0 %67 }
 0x116   :  { %v70_v28 = vmul.f32 %v68_v27, %v56_v13 }
 0x118   :  { %80 = vrot.lane.b32.xlu1 %v70_v28, %s1914_s19 }
 0x120   :  { %149 = vrot.lane.b32.xlu1 %v38_v29, %s1913_s27 }
 0x18a   :  { %v81_v30 = vpop.permute.xlu1 %80 }
 0x18b   :  { %1586 = vmatmul.msk.f32.vlgmr.msra.gmra.mxu0 %vm82_vm4, %v81_v30  ;;  %1587 = vmatmul.msk.f32.vlgmr.msra.gmra.mxu1 %vm82_vm4, %v81_v30 }
 0x192   :  { %v150_v2 = vpop.permute.xlu1 %149 }
 0x208   :  { %v102_v34 = vpop.f32.mrf.mxu0  ;;  %v122_v35 = vpop.f32.mrf.mxu1 }
 0x209   :  { %v249_v36 = vadd.f32 %v1593_v33, %v102_v34  ;;  %v125_v37 = vadd.f32 %v122_v35, %v38_v29 }
 0x20b   :  { %v1595_v39 = vmul.f32 -1.442695, %v249_v36  ;;  %v1588_v40 = vmul.f32 -1.442695, %v125_v37 }
 0x20d   :  { %1751 = vpow2.f32 %v1595_v39  ;;  %v1603_v39 = vld [vmem:[%s2444_s1 + $0x70] sm:$0xff] }
 0x20e   :  { %1753 = vpow2.f32 %v1588_v40  ;;  %v1604_v40 = vld [vmem:[%s2444_s1 + $0x78] sm:$0xff]  ;;  %318 = vmatpush.msrb.mxu0 %v1603_v39 }
 0x20f   :  { %338 = vmatpush.msrb.mxu1 %v1604_v40 }
 0x210   :  { %319 = vmatpush.msrb.mxu0 %v1601_v41 }
 0x213   :  { %v1752_v42 = vpop.eup %1751 }
 0x214   :  { %v1754_v43 = vpop.eup %1753  ;;  %v253_v44 = vadd.f32 1.0, %v1752_v42  ;;  %v1602_v42 = vld [vmem:[%s2444_s1 + $0x68] sm:$0xff] }
 0x215   :  { %v129_v45 = vadd.f32 1.0, %v1754_v43  ;;  %v1599_v43 = vld [vmem:[%s2444_s1 + $0x50] sm:$0xff]  ;;  %339 = vmatpush.msrb.mxu1 %v1602_v42 }
 0x216   :  { %1755 = vrcp.f32 %v253_v44  ;;  %v265_v52 = vand.u32 2147483648, %v253_v44  ;;  %v263_v55 = vand.u32 2147483647, %v253_v44  ;;  %vm259_vm7 = vweird.f32 %v253_v44  ;;  %320 = vmatpush.msrb.mxu0 %v1599_v43 }
 0x217   :  { %1757 = vrcp.f32 %v129_v45  ;;  %v141_v53 = vand.u32 2147483648, %v129_v45  ;;  %v139_v57 = vand.u32 2147483647, %v129_v45  ;;  %vm135_vm8 = vweird.f32 %v129_v45 }
 0x218   :  { %v266_v60 = vor.u32 1.1754944e-38, %v265_v52  ;;  %vm264_vm11 = vcmp.eq.f32.partialorder %v263_v55, 8.507059e+37 }
 0x219   :  { %v142_v61 = vor.u32 1.1754944e-38, %v141_v53  ;;  %vm140_vm12 = vcmp.eq.f32.partialorder %v139_v57, 8.507059e+37  ;;  %v1611_v57 = vld [vmem:[%s2445_s2 + $0x30] sm:$0xff] }
 0x21c   :  { %v1756_v46 = vpop.eup %1755 }
 0x21d   :  { %v1758_v47 = vpop.eup %1757  ;;  %v255_v48 = vmul.f32 %v1756_v46, %v253_v44  ;;  %vm260_vm5 = vweird.f32 %v1756_v46  ;;  %v1600_v44 = vld [vmem:[%s2444_s1 + $0x58] sm:$0xff] }
 0x21e   :  { %v131_v49 = vmul.f32 %v1758_v47, %v129_v45  ;;  %vm136_vm6 = vweird.f32 %v1758_v47  ;;  %vm261_vm9 = vmor %vm259_vm7, %vm260_vm5  ;;  %v1597_v45 = vld [vmem:[%s2444_s1 + $0x40] sm:$0xff]  ;;  %340 = vmatpush.msrb.mxu1 %v1600_v44 }
 0x21f   :  { %v256_v50 = vsub.f32 1.0, %v255_v48  ;;  %vm137_vm10 = vmor %vm135_vm8, %vm136_vm6  ;;  %321 = vmatpush.msrb.mxu0 %v1597_v45  ;;  %v220_v48 = vld [vmem:[#allocation2 + $0x18] sm:$0xff] }
 0x220   :  { %v132_v51 = vsub.f32 1.0, %v131_v49  ;;  %v219_v49 = vld [vmem:[#allocation2 + $0x10] sm:$0xff]  ;;  %238 = vmatpush.msra.mxu3 %v220_v48 }
 0x221   :  { %v257_v54 = vmul.f32 %v1756_v46, %v256_v50  ;;  %v218_v50 = vld [vmem:[#allocation2 + $0x8] sm:$0xff] }
 0x222   :  { %v133_v56 = vmul.f32 %v1758_v47, %v132_v51  ;;  %239 = vmatpush.msra.mxu3 %v219_v49  ;;  %v217_v51 = vld [vmem:[#allocation2] sm:$0xff] }
 0x223   :  { %v258_v58 = vadd.f32 %v1756_v46, %v257_v54 }
 0x224   :  { %v134_v59 = vadd.f32 %v1758_v47, %v133_v56  ;;  %240 = vmatpush.msra.mxu3 %v218_v50  ;;  %v1612_v56 = vld [vmem:[%s2445_s2 + $0x38] sm:$0xff] }
 0x225   :  { %v262_v62 = vsel %vm261_vm9, %v1756_v46, %v258_v58  ;;  %v1598_v46 = vld [vmem:[%s2444_s1 + $0x48] sm:$0xff]  ;;  %400 = vmatpush.msrb.mxu2 %v1612_v56  ;;  %v1617_v58 = vld [vmem:[%s2443_s0 + $0x20] sm:$0xff] }
 0x226   :  { %v138_v63 = vsel %vm137_vm10, %v1758_v47, %v134_v59  ;;  %v267_v0 = vsel %vm264_vm11, %v266_v60, %v262_v62  ;;  %341 = vmatpush.msrb.mxu1 %v1598_v46  ;;  %v1594_v47 = vld [vmem:[%s2443_s0 + $0x18] sm:$0xff]  ;;  %241 = vmatpush.msra.mxu3 %v217_v51 }
 0x227   :  { %v143_v1 = vsel %vm140_vm12, %v142_v61, %v138_v63  ;;  %v269_v3 = vmul.f32 2.0, %v267_v0  ;;  %401 = vmatpush.msrb.mxu2 %v1611_v57  ;;  %v1610_v63 = vld [vmem:[%s2445_s2 + $0x28] sm:$0xff] }
 0x228   :  { %v147_v4 = vsub.f32 1.0, %v143_v1  ;;  %v146_v6 = vmul.f32 %v143_v1, %v81_v30 }
 0x229   :  { %v1596_v5 = vadd.f32 -1.0, %v269_v3  ;;  %402 = vmatpush.msrb.mxu2 %v1610_v63  ;;  %v1628_v63 = vld [vmem:[%s2444_s1 + $0xb8] sm:$0xff] }
 0x22a   :  { %v152_v7 = vmul.f32 %v150_v2, %v147_v4  ;;  %v1609_v2 = vld [vmem:[%s2445_s2 + $0x20] sm:$0xff]  ;;  %569 = vmatpush.msra.mxu1 %v1628_v63 }
 0x22b   :  { %277 = vrot.lane.b32.xlu2 %v1596_v5, %s1912_s3  ;;  %403 = vmatpush.msrb.mxu2 %v1609_v2  ;;  %v1621_v2 = vld [vmem:[%s2444_s1 + $0x80] sm:$0xff] }
 0x22c   :  { %v153_v8 = vadd.f32 %v152_v7, %v146_v6 }
 0x22e   :  { %1589 = vmatmul.msk.f32.vlgmr.msra.gmra.mxu2 %vm82_vm4, %v153_v8 }
 0x233   :  { %272 = vrot.lane.b32.xlu2 %v1953_v17, %s1914_s19 }
 0x285   :  { %v278_v9 = vpop.permute.xlu2 %277 }
 0x286   :  { %v280_v10 = vmul.f32 %v278_v9, %v267_v0 }
 0x288   :  { %282 = vrot.lane.b32.xlu0 %v280_v10, %s1914_s19 }
 0x28d   :  { %v273_v29 = vpop.permute.xlu2 %272 }
 0x28e   :  { %v275_v30 = vmul.f32 %v273_v29, %v267_v0 }
 0x2b1   :  { %v182_v12 = vpop.f32.mrf.mxu2 }
 0x2b2   :  { %v183_v13 = vadd.f32 %v1738_v11, %v182_v12 }
 0x2b4   :  { %v1590_v14 = vmul.f32 -1.442695, %v183_v13 }
 0x2b6   :  { %1759 = vpow2.f32 %v1590_v14 }
 0x2bc   :  { %v1760_v15 = vpop.eup %1759 }
 0x2bd   :  { %v188_v16 = vadd.f32 1.0, %v1760_v15 }
 0x2bf   :  { %1761 = vrcp.f32 %v188_v16  ;;  %v200_v21 = vand.u32 2147483648, %v188_v16  ;;  %v198_v22 = vand.u32 2147483647, %v188_v16  ;;  %vm194_vm14 = vweird.f32 %v188_v16 }
 0x2c1   :  { %v201_v24 = vor.u32 1.1754944e-38, %v200_v21  ;;  %vm199_vm0 = vcmp.eq.f32.partialorder %v198_v22, 8.507059e+37 }
 0x2c5   :  { %v1762_v18 = vpop.eup %1761 }
 0x2c6   :  { %v190_v19 = vmul.f32 %v1762_v18, %v188_v16  ;;  %vm195_vm13 = vweird.f32 %v1762_v18 }
 0x2c7   :  { %vm196_vm15 = vmor %vm194_vm14, %vm195_vm13 }
 0x2c8   :  { %v191_v20 = vsub.f32 1.0, %v190_v19 }
 0x2ca   :  { %v192_v17 = vmul.f32 %v1762_v18, %v191_v20 }
 0x2cc   :  { %v193_v23 = vadd.f32 %v1762_v18, %v192_v17 }
 0x2ce   :  { %v197_v25 = vsel %vm196_vm15, %v1762_v18, %v193_v23 }
 0x2cf   :  { %v202_v26 = vsel %vm199_vm0, %v201_v24, %v197_v25 }
 0x2d0   :  { %v204_v27 = vmul.f32 2.0, %v202_v26 }
 0x2d2   :  { %v1591_v28 = vadd.f32 -1.0, %v204_v27 }
 0x2d4   :  { %207 = vrot.lane.b32.xlu0 %v1591_v28, %s1912_s3 }
 0x2fa   :  { %v283_v31 = vpop.permute.xlu0 %282 }
 0x2fb   :  { %v2012_v32 = vadd.f32 %v283_v31, %v275_v30 }
 0x2fd   :  { %1763 = vtanh.f32 %v2012_v32 }
 0x303   :  { %v1764_v33 = vpop.eup %1763 }
 0x304   :  { %288 = vrot.lane.b32.xlu1 %v1764_v33, %s1912_s3 }
 0x346   :  { %v208_v34 = vpop.permute.xlu0 %207 }
 0x347   :  { %v2016_v35 = vmul.f32 %v208_v34, %v202_v26 }
 0x349   :  { %1765 = vtanh.f32 %v2016_v35 }
 0x34f   :  { %v1766_v36 = vpop.eup %1765 }
 0x350   :  { %213 = vrot.lane.b32.xlu1 %v1766_v36, %s1913_s27 }
 0x376   :  { %v289_v37 = vpop.permute.xlu1 %288 }
 0x377   :  { %v291_v38 = vmul.f32 %v289_v37, %v267_v0 }
 0x379   :  { %302 = vrot.lane.b32.xlu2 %v291_v38, %s1914_s19  ;;  %v1739_v38 = vld [vmem:[%s2447_s4 + $0x1] ss:$0 sm:$0xff] }
 0x381   :  { %370 = vrot.lane.b32.xlu2 %v1594_v47, %s1913_s27 }
 0x3c2   :  { %v214_v52 = vpop.permute.xlu1 %213 }
 0x3c3   :  { %v216_v53 = vmul.f32 %v214_v52, %v202_v26 }
 0x3c5   :  { %222 = vrot.lane.b32.xlu0 %v216_v53, %s1914_s19 }
 0x3d3   :  { %v303_v54 = vpop.permute.xlu2 %302 }
 0x3d4   :  { %1605 = vmatmul.msk.f32.vlgmr.msrb.gmra.mxu0 %vm82_vm4, %v303_v54  ;;  %1606 = vmatmul.msk.f32.vlgmr.msrb.gmra.mxu1 %vm82_vm4, %v303_v54 }
 0x3db   :  { %v371_v27 = vpop.permute.xlu2 %370 }
 0x437   :  { %v223_v55 = vpop.permute.xlu0 %222 }
 0x438   :  { %1592 = vmatmul.msk.f32.vlgmr.msra.gmra.mxu3 %vm82_vm4, %v223_v55 }
 0x451   :  { %v323_v59 = vpop.f32.mrf.mxu0  ;;  %v343_v60 = vpop.f32.mrf.mxu1 }
 0x452   :  { %v484_v61 = vadd.f32 %v1617_v58, %v323_v59  ;;  %v346_v62 = vadd.f32 %v1594_v47, %v343_v60 }
 0x454   :  { %v1619_v0 = vmul.f32 -1.442695, %v484_v61  ;;  %v1607_v1 = vmul.f32 -1.442695, %v346_v62  ;;  %v1627_v62 = vld [vmem:[%s2444_s1 + $0xb0] sm:$0xff] }
 0x455   :  { %549 = vmatpush.msra.mxu0 %v1627_v62 }
 0x456   :  { %1767 = vpow2.f32 %v1619_v0  ;;  %v1626_v0 = vld [vmem:[%s2444_s1 + $0xa8] sm:$0xff] }
 0x457   :  { %1769 = vpow2.f32 %v1607_v1  ;;  %v1624_v1 = vld [vmem:[%s2444_s1 + $0x98] sm:$0xff]  ;;  %570 = vmatpush.msra.mxu1 %v1626_v0 }
 0x459   :  { %571 = vmatpush.msra.mxu1 %v1624_v1 }
 0x45c   :  { %v1768_v3 = vpop.eup %1767 }
 0x45d   :  { %v1770_v4 = vpop.eup %1769  ;;  %v488_v5 = vadd.f32 1.0, %v1768_v3  ;;  %v1622_v3 = vld [vmem:[%s2444_s1 + $0x88] sm:$0xff] }
 0x45e   :  { %v350_v6 = vadd.f32 1.0, %v1770_v4  ;;  %572 = vmatpush.msra.mxu1 %v1622_v3  ;;  %v1740_v3 = vld [vmem:[%s2447_s4 + $0x2] ss:$0 sm:$0xff] }
 0x45f   :  { %1771 = vrcp.f32 %v488_v5  ;;  %v500_v13 = vand.u32 2147483648, %v488_v5  ;;  %v498_v16 = vand.u32 2147483647, %v488_v5  ;;  %vm494_vm3 = vweird.f32 %v488_v5 }
 0x460   :  { %1773 = vrcp.f32 %v350_v6  ;;  %v362_v14 = vand.u32 2147483648, %v350_v6  ;;  %v360_v19 = vand.u32 2147483647, %v350_v6  ;;  %vm356_vm5 = vweird.f32 %v350_v6 }
 0x461   :  { %v501_v17 = vor.u32 1.1754944e-38, %v500_v13  ;;  %vm499_vm8 = vcmp.eq.f32.partialorder %v498_v16, 8.507059e+37 }
 0x462   :  { %v363_v22 = vor.u32 1.1754944e-38, %v362_v14  ;;  %vm361_vm9 = vcmp.eq.f32.partialorder %v360_v19, 8.507059e+37  ;;  %v1635_v19 = vld [vmem:[%s2445_s2 + $0x50] sm:$0xff] }
 0x465   :  { %v1772_v7 = vpop.eup %1771 }
 0x466   :  { %v1774_v8 = vpop.eup %1773  ;;  %v490_v9 = vmul.f32 %v1772_v7, %v488_v5  ;;  %vm495_vm1 = vweird.f32 %v1772_v7 }
 0x467   :  { %v352_v10 = vmul.f32 %v1774_v8, %v350_v6  ;;  %vm357_vm2 = vweird.f32 %v1774_v8  ;;  %vm496_vm6 = vmor %vm494_vm3, %vm495_vm1 }
 0x468   :  { %v491_v11 = vsub.f32 1.0, %v490_v9  ;;  %vm358_vm7 = vmor %vm356_vm5, %vm357_vm2 }
 0x469   :  { %v353_v12 = vsub.f32 1.0, %v352_v10 }
 0x46a   :  { %v492_v15 = vmul.f32 %v1772_v7, %v491_v11 }
 0x46b   :  { %v354_v18 = vmul.f32 %v1774_v8, %v353_v12 }
 0x46c   :  { %v493_v20 = vadd.f32 %v1772_v7, %v492_v15 }
 0x46d   :  { %v355_v21 = vadd.f32 %v1774_v8, %v354_v18  ;;  %v1636_v18 = vld [vmem:[%s2445_s2 + $0x58] sm:$0xff] }
 0x46e   :  { %v497_v23 = vsel %vm496_vm6, %v1772_v7, %v493_v20  ;;  %631 = vmatpush.msra.mxu2 %v1636_v18  ;;  %v1641_v20 = vld [vmem:[%s2443_s0 + $0x30] sm:$0xff] }
 0x46f   :  { %v359_v24 = vsel %vm358_vm7, %v1774_v8, %v355_v21  ;;  %v2068_v25 = vsel %vm499_vm8, %v501_v17, %v497_v23  ;;  %v1618_v8 = vld [vmem:[%s2443_s0 + $0x28] sm:$0xff] }
 0x470   :  { %v364_v26 = vsel %vm361_vm9, %v363_v22, %v359_v24  ;;  %v504_v28 = vmul.f32 2.0, %v2068_v25  ;;  %v506_v58 = vmul.f32 %v2068_v25, %v2012_v32  ;;  %v1625_v32 = vld [vmem:[%s2444_s1 + $0xa0] sm:$0xff]  ;;  %632 = vmatpush.msra.mxu2 %v1635_v19  ;;  %v1634_v24 = vld [vmem:[%s2445_s2 + $0x48] sm:$0xff] }
 0x471   :  { %v368_v29 = vsub.f32 1.0, %v364_v26  ;;  %v367_v31 = vmul.f32 %v364_v26, %v303_v54  ;;  %550 = vmatpush.msra.mxu0 %v1625_v32 }
 0x472   :  { %v1620_v30 = vadd.f32 -1.0, %v504_v28  ;;  %633 = vmatpush.msra.mxu2 %v1634_v24  ;;  %v455_v28 = vld [vmem:[#allocation2 + $0x38] sm:$0xff] }
 0x473   :  { %v373_v33 = vmul.f32 %v371_v27, %v368_v29  ;;  %v1633_v27 = vld [vmem:[%s2445_s2 + $0x40] sm:$0xff]  ;;  %v454_v29 = vld [vmem:[#allocation2 + $0x30] sm:$0xff]  ;;  %473 = vmatpush.msrb.mxu3 %v455_v28  ;;  %v1652_v28 = vld [vmem:[%s2444_s1 + $0xf8] sm:$0xff] }
 0x474   :  { %508 = vrot.lane.b32.xlu1 %v1620_v30, %s1912_s3  ;;  %634 = vmatpush.msra.mxu2 %v1633_v27  ;;  %v453_v30 = vld [vmem:[#allocation2 + $0x28] sm:$0xff]  ;;  %v1651_v27 = vld [vmem:[%s2444_s1 + $0xf0] sm:$0xff] }
 0x475   :  { %v374_v34 = vadd.f32 %v373_v33, %v367_v31  ;;  %474 = vmatpush.msrb.mxu3 %v454_v29  ;;  %v452_v31 = vld [vmem:[#allocation2 + $0x20] sm:$0xff]  ;;  %796 = vmatpush.msrb.mxu1 %v1652_v28  ;;  %v680_v28 = vld [vmem:[#allocation2 + $0x48] sm:$0xff] }
 0x476   :  { %v1649_v29 = vld [vmem:[%s2444_s1 + $0xe0] sm:$0xff] }
 0x477   :  { %1613 = vmatmul.msk.f32.vlgmr.msrb.gmra.mxu2 %vm82_vm4, %v374_v34  ;;  %475 = vmatpush.msrb.mxu3 %v453_v30  ;;  %v1650_v30 = vld [vmem:[%s2444_s1 + $0xe8] sm:$0xff] }
 0x478   :  { %797 = vmatpush.msrb.mxu1 %v1650_v30 }
 0x479   :  { %476 = vmatpush.msrb.mxu3 %v452_v31  ;;  %v1647_v31 = vld [vmem:[%s2444_s1 + $0xd0] sm:$0xff] }
 0x4bb   :  { %v243_v41 = vpop.f32.mrf.mxu3 }
 0x4e6   :  { %v509_v36 = vpop.permute.xlu1 %508 }
 0x4e7   :  { %v511_v37 = vmul.f32 %v509_v36, %v2068_v25 }
 0x4e9   :  { %513 = vrot.lane.b32.xlu2 %v511_v37, %s1914_s19 }
 0x4fa   :  { %v405_v39 = vpop.f32.mrf.mxu2 }
 0x4fb   :  { %v406_v40 = vadd.f32 %v1739_v38, %v405_v39 }
 0x4fd   :  { %v408_v42 = vadd.f32 %v406_v40, %v243_v41 }
 0x4ff   :  { %v1614_v43 = vmul.f32 -1.442695, %v408_v42 }
 0x501   :  { %1775 = vpow2.f32 %v1614_v43 }
 0x507   :  { %v1776_v44 = vpop.eup %1775 }
 0x508   :  { %v412_v45 = vadd.f32 1.0, %v1776_v44 }
 0x50a   :  { %1777 = vrcp.f32 %v412_v45  ;;  %v424_v49 = vand.u32 2147483648, %v412_v45  ;;  %v422_v51 = vand.u32 2147483647, %v412_v45  ;;  %vm418_vm11 = vweird.f32 %v412_v45 }
 0x50c   :  { %v425_v53 = vor.u32 1.1754944e-38, %v424_v49  ;;  %vm423_vm13 = vcmp.eq.f32.partialorder %v422_v51, 8.507059e+37 }
 0x510   :  { %v1778_v46 = vpop.eup %1777 }
 0x511   :  { %v414_v47 = vmul.f32 %v1778_v46, %v412_v45  ;;  %vm419_vm10 = vweird.f32 %v1778_v46 }
 0x512   :  { %vm420_vm12 = vmor %vm418_vm11, %vm419_vm10 }
 0x513   :  { %v415_v48 = vsub.f32 1.0, %v414_v47 }
 0x515   :  { %v416_v50 = vmul.f32 %v1778_v46, %v415_v48 }
 0x517   :  { %v417_v52 = vadd.f32 %v1778_v46, %v416_v50 }
 0x519   :  { %v421_v54 = vsel %vm420_vm12, %v1778_v46, %v417_v52 }
 0x51a   :  { %v426_v55 = vsel %vm423_vm13, %v425_v53, %v421_v54 }
 0x51b   :  { %v428_v56 = vmul.f32 2.0, %v426_v55 }
 0x51d   :  { %v1615_v57 = vadd.f32 -1.0, %v428_v56 }
 0x51f   :  { %436 = vrot.lane.b32.xlu2 %v1615_v57, %s1912_s3 }
 0x543   :  { %v514_v59 = vpop.permute.xlu2 %513 }
 0x544   :  { %v2081_v60 = vadd.f32 %v514_v59, %v506_v58 }
 0x546   :  { %1779 = vtanh.f32 %v2081_v60 }
 0x54c   :  { %v1780_v61 = vpop.eup %1779 }
 0x54d   :  { %519 = vrot.lane.b32.xlu0 %v1780_v61, %s1912_s3 }
 0x555   :  { %431 = vrot.lane.b32.xlu0 %v2016_v35, %s1914_s19  ;;  %v1623_v35 = vld [vmem:[%s2444_s1 + $0x90] sm:$0xff] }
 0x556   :  { %551 = vmatpush.msra.mxu0 %v1623_v35 }
 0x558   :  { %552 = vmatpush.msra.mxu0 %v1621_v2 }
 0x55a   :  { %776 = vmatpush.msrb.mxu0 %v1651_v27 }
 0x55c   :  { %777 = vmatpush.msrb.mxu0 %v1649_v29  ;;  %v679_v29 = vld [vmem:[#allocation2 + $0x40] sm:$0xff] }
 0x55d   :  { %601 = vrot.lane.b32.xlu0 %v1618_v8, %s1913_s27 }
 0x55e   :  { %778 = vmatpush.msrb.mxu0 %v1647_v31 }
 0x579   :  { %v437_v6 = vpop.permute.xlu2 %436 }
 0x57a   :  { %v439_v7 = vmul.f32 %v437_v6, %v426_v55 }
 0x5bf   :  { %v520_v4 = vpop.permute.xlu0 %519 }
 0x5c0   :  { %v522_v5 = vmul.f32 %v520_v4, %v2068_v25 }
 0x5c2   :  { %533 = vrot.lane.b32.xlu1 %v522_v5, %s1914_s19 }
 0x5c7   :  { %v432_v10 = vpop.permute.xlu0 %431 }
 0x5c8   :  { %v434_v11 = vmul.f32 %v432_v10, %v426_v55 }
 0x5ca   :  { %441 = vrot.lane.b32.xlu1 %v439_v7, %s1914_s19 }
 0x5cf   :  { %v602_v58 = vpop.permute.xlu0 %601 }
 0x634   :  { %v2118_v9 = vpop.permute.xlu1 %533 }
 0x635   :  { %1629 = vmatmul.msk.f32.vlgmr.msra.gmra.mxu0 %vm82_vm4, %v2118_v9  ;;  %1630 = vmatmul.msk.f32.vlgmr.msra.gmra.mxu1 %vm82_vm4, %v2118_v9 }
 0x63c   :  { %v442_v12 = vpop.permute.xlu1 %441 }
 0x63d   :  { %v2124_v13 = vadd.f32 %v442_v12, %v434_v11 }
 0x63f   :  { %1781 = vtanh.f32 %v2124_v13 }
 0x645   :  { %v1782_v14 = vpop.eup %1781 }
 0x646   :  { %447 = vrot.lane.b32.xlu2 %v1782_v14, %s1912_s3 }
 0x6a0   :  { %v448_v15 = vpop.permute.xlu2 %447 }
 0x6a1   :  { %v450_v16 = vmul.f32 %v448_v15, %v426_v55 }
 0x6a3   :  { %457 = vrot.lane.b32.xlu1 %v450_v16, %s1914_s19 }
 0x6b2   :  { %v554_v21 = vpop.f32.mrf.mxu0  ;;  %v574_v17 = vpop.f32.mrf.mxu1 }
 0x6b3   :  { %v711_v22 = vadd.f32 %v1641_v20, %v554_v21  ;;  %v577_v23 = vadd.f32 %v1618_v8, %v574_v17 }
 0x6b5   :  { %v1643_v25 = vmul.f32 -1.442695, %v711_v22  ;;  %v1631_v26 = vmul.f32 -1.442695, %v577_v23 }
 0x6b7   :  { %1783 = vpow2.f32 %v1643_v25 }
 0x6b8   :  { %1785 = vpow2.f32 %v1631_v26 }
 0x6bd   :  { %v1784_v33 = vpop.eup %1783 }
 0x6be   :  { %v1786_v34 = vpop.eup %1785  ;;  %v715_v36 = vadd.f32 1.0, %v1784_v33  ;;  %v1648_v33 = vld [vmem:[%s2444_s1 + $0xd8] sm:$0xff] }
 0x6bf   :  { %v581_v37 = vadd.f32 1.0, %v1786_v34  ;;  %v1645_v34 = vld [vmem:[%s2444_s1 + $0xc0] sm:$0xff]  ;;  %798 = vmatpush.msrb.mxu1 %v1648_v33 }
 0x6c0   :  { %1787 = vrcp.f32 %v715_v36  ;;  %v727_v44 = vand.u32 2147483648, %v715_v36  ;;  %v725_v47 = vand.u32 2147483647, %v715_v36  ;;  %vm721_vm0 = vweird.f32 %v715_v36  ;;  %779 = vmatpush.msrb.mxu0 %v1645_v34 }
 0x6c1   :  { %1789 = vrcp.f32 %v581_v37  ;;  %v593_v45 = vand.u32 2147483648, %v581_v37  ;;  %v591_v49 = vand.u32 2147483647, %v581_v37  ;;  %vm587_vm1 = vweird.f32 %v581_v37 }
 0x6c2   :  { %v728_v52 = vor.u32 1.1754944e-38, %v727_v44  ;;  %vm726_vm5 = vcmp.eq.f32.partialorder %v725_v47, 8.507059e+37  ;;  %v1660_v47 = vld [vmem:[%s2445_s2 + $0x78] sm:$0xff] }
 0x6c3   :  { %v594_v53 = vor.u32 1.1754944e-38, %v593_v45  ;;  %vm592_vm6 = vcmp.eq.f32.partialorder %v591_v49, 8.507059e+37  ;;  %858 = vmatpush.msrb.mxu2 %v1660_v47 }
 0x6c6   :  { %v1788_v38 = vpop.eup %1787 }
 0x6c7   :  { %v1790_v39 = vpop.eup %1789  ;;  %v717_v40 = vmul.f32 %v1788_v38, %v715_v36  ;;  %vm722_vm14 = vweird.f32 %v1788_v38  ;;  %v1646_v36 = vld [vmem:[%s2444_s1 + $0xc8] sm:$0xff] }
 0x6c8   :  { %v583_v41 = vmul.f32 %v1790_v39, %v581_v37  ;;  %vm588_vm15 = vweird.f32 %v1790_v39  ;;  %vm723_vm2 = vmor %vm721_vm0, %vm722_vm14  ;;  %799 = vmatpush.msrb.mxu1 %v1646_v36 }
 0x6c9   :  { %v718_v42 = vsub.f32 1.0, %v717_v40  ;;  %vm589_vm3 = vmor %vm587_vm1, %vm588_vm15 }
 0x6ca   :  { %v584_v43 = vsub.f32 1.0, %v583_v41 }
 0x6cb   :  { %v719_v46 = vmul.f32 %v1788_v38, %v718_v42  ;;  %v1642_v42 = vld [vmem:[%s2443_s0 + $0x38] sm:$0xff] }
 0x6cc   :  { %v585_v48 = vmul.f32 %v1790_v39, %v584_v43 }
 0x6cd   :  { %v720_v50 = vadd.f32 %v1788_v38, %v719_v46 }
 0x6ce   :  { %v586_v51 = vadd.f32 %v1790_v39, %v585_v48  ;;  %v1659_v48 = vld [vmem:[%s2445_s2 + $0x70] sm:$0xff] }
 0x6cf   :  { %v724_v54 = vsel %vm723_vm2, %v1788_v38, %v720_v50  ;;  %859 = vmatpush.msrb.mxu2 %v1659_v48 }
 0x6d0   :  { %v590_v55 = vsel %vm589_vm3, %v1790_v39, %v586_v51  ;;  %v2144_v56 = vsel %vm726_vm5, %v728_v52, %v724_v54 }
 0x6d1   :  { %v595_v57 = vsel %vm592_vm6, %v594_v53, %v590_v55  ;;  %v731_v59 = vmul.f32 2.0, %v2144_v56  ;;  %v1658_v53 = vld [vmem:[%s2445_s2 + $0x68] sm:$0xff] }
 0x6d2   :  { %v599_v61 = vsub.f32 1.0, %v595_v57  ;;  %v598_v63 = vmul.f32 %v595_v57, %v2118_v9  ;;  %v733_v9 = vmul.f32 %v2144_v56, %v2081_v60  ;;  %860 = vmatpush.msrb.mxu2 %v1658_v53  ;;  %v682_v57 = vld [vmem:[#allocation2 + $0x58] sm:$0xff] }
 0x6d3   :  { %v1644_v62 = vadd.f32 -1.0, %v731_v59  ;;  %700 = vmatpush.msra.mxu3 %v682_v57 }
 0x6d4   :  { %v604_v32 = vmul.f32 %v602_v58, %v599_v61  ;;  %v681_v58 = vld [vmem:[#allocation2 + $0x50] sm:$0xff] }
 0x6d5   :  { %735 = vrot.lane.b32.xlu2 %v1644_v62, %s1912_s3  ;;  %701 = vmatpush.msra.mxu3 %v681_v58 }
 0x6d6   :  { %v605_v0 = vadd.f32 %v604_v32, %v598_v63 }
 0x6d7   :  { %702 = vmatpush.msra.mxu3 %v680_v28 }
 0x6d8   :  { %1637 = vmatmul.msk.f32.vlgmr.msra.gmra.mxu2 %vm82_vm4, %v605_v0 }
 0x6d9   :  { %703 = vmatpush.msra.mxu3 %v679_v29 }
 0x715   :  { %v458_v35 = vpop.permute.xlu1 %457 }
 0x716   :  { %1616 = vmatmul.msk.f32.vlgmr.msrb.gmra.mxu3 %vm82_vm4, %v458_v35 }
 0x72f   :  { %v736_v1 = vpop.permute.xlu2 %735 }
 0x730   :  { %v738_v2 = vmul.f32 %v736_v1, %v2144_v56 }
 0x732   :  { %740 = vrot.lane.b32.xlu0 %v738_v2, %s1914_s19 }
 0x75b   :  { %v636_v4 = vpop.f32.mrf.mxu2 }
 0x75c   :  { %v637_v5 = vadd.f32 %v1740_v3, %v636_v4 }
 0x799   :  { %v478_v6 = vpop.f32.mrf.mxu3 }
 0x79a   :  { %v639_v7 = vadd.f32 %v637_v5, %v478_v6 }
 0x79c   :  { %v1638_v8 = vmul.f32 -1.442695, %v639_v7 }
 0x79e   :  { %1791 = vpow2.f32 %v1638_v8 }
 0x7a4   :  { %v1792_v10 = vpop.eup %1791  ;;  %v741_v11 = vpop.permute.xlu0 %740 }
 0x7a5   :  { %v643_v12 = vadd.f32 1.0, %v1792_v10  ;;  %v2158_v14 = vadd.f32 %v741_v11, %v733_v9 }
 0x7a7   :  { %1793 = vrcp.f32 %v643_v12  ;;  %v655_v20 = vand.u32 2147483648, %v643_v12  ;;  %v653_v17 = vand.u32 2147483647, %v643_v12  ;;  %vm649_vm8 = vweird.f32 %v643_v12 }
 0x7a8   :  { %1795 = vtanh.f32 %v2158_v14 }
 0x7a9   :  { %v656_v60 = vor.u32 1.1754944e-38, %v655_v20  ;;  %vm654_vm10 = vcmp.eq.f32.partialorder %v653_v17, 8.507059e+37 }
 0x7ad   :  { %v1794_v15 = vpop.eup %1793 }
 0x7ae   :  { %v1796_v16 = vpop.eup %1795  ;;  %v645_v18 = vmul.f32 %v1794_v15, %v643_v12  ;;  %vm650_vm7 = vweird.f32 %v1794_v15 }
 0x7af   :  { %746 = vrot.lane.b32.xlu1 %v1796_v16, %s1912_s3  ;;  %vm651_vm9 = vmor %vm649_vm8, %vm650_vm7 }
 0x7b0   :  { %v646_v19 = vsub.f32 1.0, %v645_v18 }
 0x7b2   :  { %v647_v21 = vmul.f32 %v1794_v15, %v646_v19 }
 0x7b4   :  { %v648_v22 = vadd.f32 %v1794_v15, %v647_v21 }
 0x7b6   :  { %v652_v23 = vsel %vm651_vm9, %v1794_v15, %v648_v22 }
 0x7b7   :  { %v657_v24 = vsel %vm654_vm10, %v656_v60, %v652_v23 }
 0x7b8   :  { %v659_v25 = vmul.f32 2.0, %v657_v24  ;;  %v661_v43 = vmul.f32 %v657_v24, %v2124_v13  ;;  %v1665_v13 = vld [vmem:[%s2443_s0 + $0x40] sm:$0xff] }
 0x7ba   :  { %v1639_v26 = vadd.f32 -1.0, %v659_v25 }
 0x7bc   :  { %663 = vrot.lane.b32.xlu0 %v1639_v26, %s1912_s3 }
 0x7c4   :  { %828 = vrot.lane.b32.xlu0 %v1642_v42, %s1913_s27 }
 0x821   :  { %v747_v37 = vpop.permute.xlu1 %746 }
 0x822   :  { %v749_v38 = vmul.f32 %v747_v37, %v2144_v56  ;;  %v1657_v56 = vld [vmem:[%s2445_s2 + $0x60] sm:$0xff] }
 0x823   :  { %861 = vmatpush.msrb.mxu2 %v1657_v56 }
 0x824   :  { %760 = vrot.lane.b32.xlu2 %v749_v38, %s1914_s19 }
 0x82e   :  { %v664_v39 = vpop.permute.xlu0 %663 }
 0x82f   :  { %v666_v40 = vmul.f32 %v664_v39, %v657_v24  ;;  %v1741_v39 = vld [vmem:[%s2447_s4 + $0x3] ss:$0 sm:$0xff] }
 0x831   :  { %668 = vrot.lane.b32.xlu1 %v666_v40, %s1914_s19 }
 0x836   :  { %v829_v22 = vpop.permute.xlu0 %828 }
 0x87e   :  { %v2190_v41 = vpop.permute.xlu2 %760 }
 0x87f   :  { %1653 = vmatmul.msk.f32.vlgmr.msrb.gmra.mxu0 %vm82_vm4, %v2190_v41  ;;  %1654 = vmatmul.msk.f32.vlgmr.msrb.gmra.mxu1 %vm82_vm4, %v2190_v41 }
 0x8a3   :  { %v669_v44 = vpop.permute.xlu1 %668 }
 0x8a4   :  { %v2201_v45 = vadd.f32 %v669_v44, %v661_v43 }
 0x8a6   :  { %1797 = vtanh.f32 %v2201_v45 }
 0x8ac   :  { %v1798_v46 = vpop.eup %1797 }
 0x8ad   :  { %674 = vrot.lane.b32.xlu2 %v1798_v46, %s1912_s3 }
 0x8fc   :  { %v781_v49 = vpop.f32.mrf.mxu0  ;;  %v801_v50 = vpop.f32.mrf.mxu1 }
 0x8fd   :  { %v938_v51 = vadd.f32 %v1665_v13, %v781_v49  ;;  %v804_v52 = vadd.f32 %v1642_v42, %v801_v50 }
 0x8ff   :  { %v1667_v54 = vmul.f32 -1.442695, %v938_v51  ;;  %v1655_v55 = vmul.f32 -1.442695, %v804_v52 }
 0x901   :  { %1799 = vpow2.f32 %v1667_v54 }
 0x902   :  { %1801 = vpow2.f32 %v1655_v55 }
 0x907   :  { %v1800_v59 = vpop.eup %1799  ;;  %v675_v61 = vpop.permute.xlu2 %674 }
 0x908   :  { %v1802_v62 = vpop.eup %1801  ;;  %v942_v63 = vadd.f32 1.0, %v1800_v59  ;;  %v677_v32 = vmul.f32 %v675_v61, %v657_v24  ;;  %v1675_v61 = vld [vmem:[%s2444_s1 + $0x130] sm:$0xff] }
 0x909   :  { %v808_v0 = vadd.f32 1.0, %v1802_v62  ;;  %v1676_v62 = vld [vmem:[%s2444_s1 + $0x138] sm:$0xff]  ;;  %1003 = vmatpush.msra.mxu0 %v1675_v61  ;;  %v907_v61 = vld [vmem:[#allocation2 + $0x68] sm:$0xff] }
 0x90a   :  { %1803 = vrcp.f32 %v942_v63  ;;  %684 = vrot.lane.b32.xlu1 %v677_v32, %s1914_s19  ;;  %v954_v6 = vand.u32 2147483648, %v942_v63  ;;  %v952_v9 = vand.u32 2147483647, %v942_v63  ;;  %vm948_vm13 = vweird.f32 %v942_v63  ;;  %1023 = vmatpush.msra.mxu1 %v1676_v62  ;;  %v1674_v32 = vld [vmem:[%s2444_s1 + $0x128] sm:$0xff]  ;;  %v906_v62 = vld [vmem:[#allocation2 + $0x60] sm:$0xff] }
 0x90b   :  { %1805 = vrcp.f32 %v808_v0  ;;  %v820_v7 = vand.u32 2147483648, %v808_v0  ;;  %v818_v11 = vand.u32 2147483647, %v808_v0  ;;  %vm814_vm14 = vweird.f32 %v808_v0 }
 0x90c   :  { %v955_v16 = vor.u32 1.1754944e-38, %v954_v6  ;;  %vm953_vm1 = vcmp.eq.f32.partialorder %v952_v9, 8.507059e+37  ;;  %1024 = vmatpush.msra.mxu1 %v1674_v32 }
 0x90d   :  { %v821_v18 = vor.u32 1.1754944e-38, %v820_v7  ;;  %vm819_vm2 = vcmp.eq.f32.partialorder %v818_v11, 8.507059e+37  ;;  %v1684_v11 = vld [vmem:[%s2445_s2 + $0x98] sm:$0xff] }
 0x90e   :  { %1085 = vmatpush.msra.mxu2 %v1684_v11 }
 0x910   :  { %v1804_v35 = vpop.eup %1803 }
 0x911   :  { %v1806_v1 = vpop.eup %1805  ;;  %v944_v2 = vmul.f32 %v1804_v35, %v942_v63  ;;  %vm949_vm11 = vweird.f32 %v1804_v35  ;;  %v1673_v63 = vld [vmem:[%s2444_s1 + $0x120] sm:$0xff] }
 0x912   :  { %v810_v3 = vmul.f32 %v1806_v1, %v808_v0  ;;  %vm815_vm12 = vweird.f32 %v1806_v1  ;;  %vm950_vm15 = vmor %vm948_vm13, %vm949_vm11  ;;  %v1671_v0 = vld [vmem:[%s2444_s1 + $0x110] sm:$0xff]  ;;  %1004 = vmatpush.msra.mxu0 %v1673_v63 }
 0x913   :  { %v945_v4 = vsub.f32 1.0, %v944_v2  ;;  %vm816_vm0 = vmor %vm814_vm14, %vm815_vm12  ;;  %v1670_v2 = vld [vmem:[%s2444_s1 + $0x108] sm:$0xff] }
 0x914   :  { %v811_v5 = vsub.f32 1.0, %v810_v3  ;;  %1005 = vmatpush.msra.mxu0 %v1671_v0 }
 0x915   :  { %v946_v8 = vmul.f32 %v1804_v35, %v945_v4 }
 0x916   :  { %v812_v10 = vmul.f32 %v1806_v1, %v811_v5  ;;  %v1666_v5 = vld [vmem:[%s2443_s0 + $0x48] sm:$0xff] }
 0x917   :  { %v947_v12 = vadd.f32 %v1804_v35, %v946_v8 }
 0x918   :  { %v813_v15 = vadd.f32 %v1806_v1, %v812_v10 }
 0x919   :  { %v951_v19 = vsel %vm950_vm15, %v1804_v35, %v947_v12  ;;  %v1672_v35 = vld [vmem:[%s2444_s1 + $0x118] sm:$0xff]  ;;  %v1683_v12 = vld [vmem:[%s2445_s2 + $0x90] sm:$0xff] }
 0x91a   :  { %v817_v20 = vsel %vm816_vm0, %v1806_v1, %v813_v15  ;;  %v956_v21 = vsel %vm953_vm1, %v955_v16, %v951_v19  ;;  %v1669_v1 = vld [vmem:[%s2444_s1 + $0x100] sm:$0xff]  ;;  %1025 = vmatpush.msra.mxu1 %v1672_v35  ;;  %1086 = vmatpush.msra.mxu2 %v1683_v12 }
 0x91b   :  { %v822_v17 = vsel %vm819_vm2, %v821_v18, %v817_v20  ;;  %v958_v60 = vmul.f32 2.0, %v956_v21  ;;  %v960_v34 = vmul.f32 %v956_v21, %v2158_v14  ;;  %1006 = vmatpush.msra.mxu0 %v1669_v1  ;;  %v1682_v20 = vld [vmem:[%s2445_s2 + $0x88] sm:$0xff] }
 0x91c   :  { %v826_v23 = vsub.f32 1.0, %v822_v17  ;;  %v825_v25 = vmul.f32 %v822_v17, %v2190_v41  ;;  %1026 = vmatpush.msra.mxu1 %v1670_v2  ;;  %1087 = vmatpush.msra.mxu2 %v1682_v20 }
 0x91d   :  { %v1668_v24 = vadd.f32 -1.0, %v958_v60 }
 0x91e   :  { %v831_v26 = vmul.f32 %v829_v22, %v826_v23  ;;  %v1681_v22 = vld [vmem:[%s2445_s2 + $0x80] sm:$0xff] }
 0x91f   :  { %962 = vrot.lane.b32.xlu2 %v1668_v24, %s1912_s3  ;;  %1088 = vmatpush.msra.mxu2 %v1681_v22 }
 0x920   :  { %v832_v27 = vadd.f32 %v831_v26, %v825_v25 }
 0x922   :  { %1661 = vmatmul.msk.f32.vlgmr.msrb.gmra.mxu2 %vm82_vm4, %v832_v27 }
 0x979   :  { %v963_v30 = vpop.permute.xlu2 %962 }
 0x97a   :  { %v965_v31 = vmul.f32 %v963_v30, %v956_v21 }
 0x97c   :  { %967 = vrot.lane.b32.xlu0 %v965_v31, %s1914_s19  ;;  %v685_v33 = vpop.permute.xlu1 %684 }
 0x97d   :  { %1640 = vmatmul.msk.f32.vlgmr.msra.gmra.mxu3 %vm82_vm4, %v685_v33 }
 0x9a5   :  { %v863_v40 = vpop.f32.mrf.mxu2 }
 0x9a6   :  { %v864_v41 = vadd.f32 %v1741_v39, %v863_v40 }
 0x9ee   :  { %v968_v36 = vpop.permute.xlu0 %967 }
 0x9ef   :  { %v2227_v37 = vadd.f32 %v968_v36, %v960_v34 }
 0x9f1   :  { %1807 = vtanh.f32 %v2227_v37 }
 0x9f7   :  { %v1808_v38 = vpop.eup %1807 }
 0x9f8   :  { %973 = vrot.lane.b32.xlu1 %v1808_v38, %s1912_s3 }
 0xa00   :  { %v705_v42 = vpop.f32.mrf.mxu3 }
 0xa01   :  { %v866_v43 = vadd.f32 %v864_v41, %v705_v42 }
 0xa03   :  { %v1662_v44 = vmul.f32 -1.442695, %v866_v43 }
 0xa05   :  { %1809 = vpow2.f32 %v1662_v44 }
 0xa0b   :  { %v1810_v46 = vpop.eup %1809 }
 0xa0c   :  { %v870_v14 = vadd.f32 1.0, %v1810_v46 }
 0xa0e   :  { %1811 = vrcp.f32 %v870_v14  ;;  %v882_v49 = vand.u32 2147483648, %v870_v14  ;;  %v880_v51 = vand.u32 2147483647, %v870_v14  ;;  %vm876_vm5 = vweird.f32 %v870_v14 }
 0xa10   :  { %v883_v53 = vor.u32 1.1754944e-38, %v882_v49  ;;  %vm881_vm7 = vcmp.eq.f32.partialorder %v880_v51, 8.507059e+37 }
 0xa14   :  { %v1812_v47 = vpop.eup %1811 }
 0xa15   :  { %v872_v48 = vmul.f32 %v1812_v47, %v870_v14  ;;  %vm877_vm3 = vweird.f32 %v1812_v47 }
 0xa16   :  { %vm878_vm6 = vmor %vm876_vm5, %vm877_vm3 }
 0xa17   :  { %v873_v13 = vsub.f32 1.0, %v872_v48 }
 0xa19   :  { %v874_v50 = vmul.f32 %v1812_v47, %v873_v13 }
 0xa1b   :  { %v875_v52 = vadd.f32 %v1812_v47, %v874_v50 }
 0xa1d   :  { %v879_v54 = vsel %vm878_vm6, %v1812_v47, %v875_v52 }
 0xa1e   :  { %v2234_v55 = vsel %vm881_vm7, %v883_v53, %v879_v54 }
 0xa1f   :  { %v886_v56 = vmul.f32 2.0, %v2234_v55  ;;  %v888_v7 = vmul.f32 %v2234_v55, %v2201_v45  ;;  %v1689_v45 = vld [vmem:[%s2443_s0 + $0x50] sm:$0xff] }
 0xa21   :  { %v1663_v57 = vadd.f32 -1.0, %v886_v56 }
 0xa23   :  { %890 = vrot.lane.b32.xlu0 %v1663_v57, %s1912_s3 }
 0xa2b   :  { %1055 = vrot.lane.b32.xlu0 %v1666_v5, %s1913_s27 }
 0xa6a   :  { %v974_v58 = vpop.permute.xlu1 %973 }
 0xa6b   :  { %v976_v59 = vmul.f32 %v974_v58, %v956_v21  ;;  %v909_v58 = vld [vmem:[#allocation2 + $0x78] sm:$0xff] }
 0xa6c   :  { %927 = vmatpush.msrb.mxu3 %v909_v58 }
 0xa6d   :  { %987 = vrot.lane.b32.xlu2 %v976_v59, %s1914_s19  ;;  %v908_v59 = vld [vmem:[#allocation2 + $0x70] sm:$0xff] }
 0xa6e   :  { %928 = vmatpush.msrb.mxu3 %v908_v59 }
 0xa70   :  { %929 = vmatpush.msrb.mxu3 %v907_v61 }
 0xa72   :  { %930 = vmatpush.msrb.mxu3 %v906_v62 }
 0xa95   :  { %v891_v3 = vpop.permute.xlu0 %890 }
 0xa96   :  { %v893_v4 = vmul.f32 %v891_v3, %v2234_v55  ;;  %v1742_v3 = vld [vmem:[%s2447_s4 + $0x4] ss:$0 sm:$0xff] }
 0xa98   :  { %895 = vrot.lane.b32.xlu1 %v893_v4, %s1914_s19 }
 0xa9d   :  { %v1056_v13 = vpop.permute.xlu0 %1055 }
 0xac7   :  { %v2269_v6 = vpop.permute.xlu2 %987 }
 0xac8   :  { %1677 = vmatmul.msk.f32.vlgmr.msra.gmra.mxu0 %vm82_vm4, %v2269_v6  ;;  %1678 = vmatmul.msk.f32.vlgmr.msra.gmra.mxu1 %vm82_vm4, %v2269_v6 }
 0xb0a   :  { %v896_v8 = vpop.permute.xlu1 %895 }
 0xb0b   :  { %v2277_v9 = vadd.f32 %v896_v8, %v888_v7 }
 0xb0d   :  { %1813 = vtanh.f32 %v2277_v9 }
 0xb13   :  { %v1814_v10 = vpop.eup %1813 }
 0xb14   :  { %901 = vrot.lane.b32.xlu2 %v1814_v10, %s1912_s3 }
 0xb45   :  { %v1008_v15 = vpop.f32.mrf.mxu0  ;;  %v1028_v16 = vpop.f32.mrf.mxu1 }
 0xb46   :  { %v1165_v18 = vadd.f32 %v1689_v45, %v1008_v15  ;;  %v1031_v19 = vadd.f32 %v1666_v5, %v1028_v16 }
 0xb48   :  { %v1691_v21 = vmul.f32 -1.442695, %v1165_v18  ;;  %v1679_v17 = vmul.f32 -1.442695, %v1031_v19 }
 0xb4a   :  { %1815 = vpow2.f32 %v1691_v21 }
 0xb4b   :  { %1817 = vpow2.f32 %v1679_v17 }
 0xb50   :  { %v1816_v60 = vpop.eup %1815 }
 0xb51   :  { %v1818_v23 = vpop.eup %1817  ;;  %v1169_v24 = vadd.f32 1.0, %v1816_v60 }
 0xb52   :  { %v1035_v25 = vadd.f32 1.0, %v1818_v23 }
 0xb53   :  { %1819 = vrcp.f32 %v1169_v24  ;;  %v1181_v33 = vand.u32 2147483648, %v1169_v24  ;;  %v1179_v38 = vand.u32 2147483647, %v1169_v24  ;;  %vm1175_vm10 = vweird.f32 %v1169_v24 }
 0xb54   :  { %1821 = vrcp.f32 %v1035_v25  ;;  %v1047_v34 = vand.u32 2147483648, %v1035_v25  ;;  %v1045_v40 = vand.u32 2147483647, %v1035_v25  ;;  %vm1041_vm11 = vweird.f32 %v1035_v25 }
 0xb55   :  { %v1182_v43 = vor.u32 1.1754944e-38, %v1181_v33  ;;  %vm1180_vm14 = vcmp.eq.f32.partialorder %v1179_v38, 8.507059e+37  ;;  %v1694_v33 = vld [vmem:[%s2444_s1 + $0x148] sm:$0xff] }
 0xb56   :  { %v1048_v44 = vor.u32 1.1754944e-38, %v1047_v34  ;;  %vm1046_vm15 = vcmp.eq.f32.partialorder %v1045_v40, 8.507059e+37  ;;  %v1690_v34 = vld [vmem:[%s2443_s0 + $0x58] sm:$0xff] }
 0xb59   :  { %v1820_v26 = vpop.eup %1819 }
 0xb5a   :  { %v1822_v27 = vpop.eup %1821  ;;  %v1171_v28 = vmul.f32 %v1820_v26, %v1169_v24  ;;  %vm1176_vm8 = vweird.f32 %v1820_v26 }
 0xb5b   :  { %v1037_v29 = vmul.f32 %v1822_v27, %v1035_v25  ;;  %vm1042_vm9 = vweird.f32 %v1822_v27  ;;  %vm1177_vm12 = vmor %vm1175_vm10, %vm1176_vm8  ;;  %v1699_v25 = vld [vmem:[%s2444_s1 + $0x170] sm:$0xff] }
 0xb5c   :  { %v1172_v30 = vsub.f32 1.0, %v1171_v28  ;;  %vm1043_vm13 = vmor %vm1041_vm11, %vm1042_vm9  ;;  %1230 = vmatpush.msrb.mxu0 %v1699_v25  ;;  %v1698_v28 = vld [vmem:[%s2444_s1 + $0x168] sm:$0xff]  ;;  %v1136_v25 = vld [vmem:[#allocation2 + $0x98] sm:$0xff] }
 0xb5d   :  { %v1038_v31 = vsub.f32 1.0, %v1037_v29  ;;  %v1695_v29 = vld [vmem:[%s2444_s1 + $0x150] sm:$0xff]  ;;  %1154 = vmatpush.msra.mxu3 %v1136_v25 }
 0xb5e   :  { %v1173_v36 = vmul.f32 %v1820_v26, %v1172_v30  ;;  %v1696_v30 = vld [vmem:[%s2444_s1 + $0x158] sm:$0xff] }
 0xb5f   :  { %v1039_v39 = vmul.f32 %v1822_v27, %v1038_v31  ;;  %v1693_v31 = vld [vmem:[%s2444_s1 + $0x140] sm:$0xff] }
 0xb60   :  { %v1174_v41 = vadd.f32 %v1820_v26, %v1173_v36 }
 0xb61   :  { %v1040_v42 = vadd.f32 %v1822_v27, %v1039_v39 }
 0xb62   :  { %v1178_v46 = vsel %vm1177_vm12, %v1820_v26, %v1174_v41  ;;  %v1700_v26 = vld [vmem:[%s2444_s1 + $0x178] sm:$0xff] }
 0xb63   :  { %v1044_v14 = vsel %vm1043_vm13, %v1822_v27, %v1040_v42  ;;  %v1183_v47 = vsel %vm1180_vm14, %v1182_v43, %v1178_v46  ;;  %v1697_v27 = vld [vmem:[%s2444_s1 + $0x160] sm:$0xff]  ;;  %1250 = vmatpush.msrb.mxu1 %v1700_v26  ;;  %v1707_v46 = vld [vmem:[%s2445_s2 + $0xb0] sm:$0xff] }
 0xb64   :  { %v1049_v48 = vsel %vm1046_vm15, %v1048_v44, %v1044_v14  ;;  %v1185_v49 = vmul.f32 2.0, %v1183_v47  ;;  %v1187_v35 = vmul.f32 %v1183_v47, %v2227_v37  ;;  %1231 = vmatpush.msrb.mxu0 %v1697_v27  ;;  %v1708_v44 = vld [vmem:[%s2445_s2 + $0xb8] sm:$0xff]  ;;  %v1135_v26 = vld [vmem:[#allocation2 + $0x90] sm:$0xff]  ;;  %v1134_v27 = vld [vmem:[#allocation2 + $0x88] sm:$0xff] }
 0xb65   :  { %v1053_v50 = vsub.f32 1.0, %v1049_v48  ;;  %v1052_v52 = vmul.f32 %v1049_v48, %v2269_v6  ;;  %1251 = vmatpush.msrb.mxu1 %v1698_v28  ;;  %1312 = vmatpush.msrb.mxu2 %v1708_v44  ;;  %v1133_v28 = vld [vmem:[#allocation2 + $0x80] sm:$0xff] }
 0xb66   :  { %v1692_v51 = vadd.f32 -1.0, %v1185_v49  ;;  %1232 = vmatpush.msrb.mxu0 %v1695_v29  ;;  %v1706_v49 = vld [vmem:[%s2445_s2 + $0xa8] sm:$0xff]  ;;  %1155 = vmatpush.msra.mxu3 %v1135_v26 }
 0xb67   :  { %v1058_v53 = vmul.f32 %v1056_v13, %v1053_v50  ;;  %1252 = vmatpush.msrb.mxu1 %v1696_v30  ;;  %1313 = vmatpush.msrb.mxu2 %v1707_v46  ;;  %v1719_v46 = vld [vmem:[%s2444_s1 + $0x1a8] sm:$0xff] }
 0xb68   :  { %1189 = vrot.lane.b32.xlu2 %v1692_v51, %s1912_s3  ;;  %1233 = vmatpush.msrb.mxu0 %v1693_v31 }
 0xb69   :  { %v1059_v54 = vadd.f32 %v1058_v53, %v1052_v52  ;;  %1253 = vmatpush.msrb.mxu1 %v1694_v33  ;;  %1314 = vmatpush.msrb.mxu2 %v1706_v49  ;;  %v1705_v52 = vld [vmem:[%s2445_s2 + $0xa0] sm:$0xff] }
 0xb6a   :  { %1156 = vmatpush.msra.mxu3 %v1134_v27 }
 0xb6b   :  { %1685 = vmatmul.msk.f32.vlgmr.msra.gmra.mxu2 %vm82_vm4, %v1059_v54 }
 0xb6c   :  { %1315 = vmatpush.msrb.mxu2 %v1705_v52  ;;  %1157 = vmatpush.msra.mxu3 %v1133_v28 }
 0xb6e   :  { %v902_v56 = vpop.permute.xlu2 %901 }
 0xb6f   :  { %v904_v57 = vmul.f32 %v902_v56, %v2234_v55 }
 0xb71   :  { %911 = vrot.lane.b32.xlu1 %v904_v57, %s1914_s19 }
 0xbc2   :  { %v1190_v63 = vpop.permute.xlu2 %1189 }
 0xbc3   :  { %v1192_v32 = vmul.f32 %v1190_v63, %v1183_v47 }
 0xbc5   :  { %1194 = vrot.lane.b32.xlu0 %v1192_v32, %s1914_s19 }
 0xbe3   :  { %v912_v0 = vpop.permute.xlu1 %911 }
 0xbe4   :  { %1664 = vmatmul.msk.f32.vlgmr.msrb.gmra.mxu3 %vm82_vm4, %v912_v0 }
 0xbee   :  { %v1090_v4 = vpop.f32.mrf.mxu2 }
 0xbef   :  { %v1091_v5 = vadd.f32 %v1742_v3, %v1090_v4 }
 0xc37   :  { %v1195_v55 = vpop.permute.xlu0 %1194 }
 0xc38   :  { %v2304_v1 = vadd.f32 %v1195_v55, %v1187_v35 }
 0xc3a   :  { %1823 = vtanh.f32 %v2304_v1 }
 0xc40   :  { %v1824_v2 = vpop.eup %1823 }
 0xc41   :  { %1200 = vrot.lane.b32.xlu1 %v1824_v2, %s1912_s3 }
 0xc67   :  { %v932_v6 = vpop.f32.mrf.mxu3 }
 0xc68   :  { %v1093_v7 = vadd.f32 %v1091_v5, %v932_v6 }
 0xc6a   :  { %v1686_v8 = vmul.f32 -1.442695, %v1093_v7 }
 0xc6c   :  { %1825 = vpow2.f32 %v1686_v8 }
 0xc72   :  { %v1826_v10 = vpop.eup %1825 }
 0xc73   :  { %v1097_v37 = vadd.f32 1.0, %v1826_v10 }
 0xc75   :  { %1827 = vrcp.f32 %v1097_v37  ;;  %v1109_v15 = vand.u32 2147483648, %v1097_v37  ;;  %v1107_v18 = vand.u32 2147483647, %v1097_v37  ;;  %vm1103_vm1 = vweird.f32 %v1097_v37 }
 0xc77   :  { %v1110_v20 = vor.u32 1.1754944e-38, %v1109_v15  ;;  %vm1108_vm3 = vcmp.eq.f32.partialorder %v1107_v18, 8.507059e+37 }
 0xc7b   :  { %v1828_v11 = vpop.eup %1827 }
 0xc7c   :  { %v1099_v12 = vmul.f32 %v1828_v11, %v1097_v37  ;;  %vm1104_vm0 = vweird.f32 %v1828_v11 }
 0xc7d   :  { %vm1105_vm2 = vmor %vm1103_vm1, %vm1104_vm0 }
 0xc7e   :  { %v1100_v45 = vsub.f32 1.0, %v1099_v12 }
 0xc80   :  { %v1101_v16 = vmul.f32 %v1828_v11, %v1100_v45 }
 0xc82   :  { %v1102_v19 = vadd.f32 %v1828_v11, %v1101_v16 }
 0xc84   :  { %v1106_v21 = vsel %vm1105_vm2, %v1828_v11, %v1102_v19 }
 0xc85   :  { %v2311_v17 = vsel %vm1108_vm3, %v1110_v20, %v1106_v21 }
 0xc86   :  { %v1113_v22 = vmul.f32 2.0, %v2311_v17  ;;  %v1115_v40 = vmul.f32 %v2311_v17, %v2277_v9  ;;  %v1713_v9 = vld [vmem:[%s2443_s0 + $0x60] sm:$0xff] }
 0xc88   :  { %v1687_v60 = vadd.f32 -1.0, %v1113_v22 }
 0xc8a   :  { %1117 = vrot.lane.b32.xlu0 %v1687_v60, %s1912_s3 }
 0xc92   :  { %1282 = vrot.lane.b32.xlu0 %v1690_v34, %s1913_s27 }
 0xcb3   :  { %v1201_v23 = vpop.permute.xlu1 %1200 }
 0xcb4   :  { %v1203_v24 = vmul.f32 %v1201_v23, %v1183_v47 }
 0xcb6   :  { %1214 = vrot.lane.b32.xlu2 %v1203_v24, %s1914_s19 }
 0xcfc   :  { %v1118_v36 = vpop.permute.xlu0 %1117 }
 0xcfd   :  { %v1120_v38 = vmul.f32 %v1118_v36, %v2311_v17 }
 0xcff   :  { %1122 = vrot.lane.b32.xlu1 %v1120_v38, %s1914_s19 }
 0xd04   :  { %v1283_v45 = vpop.permute.xlu0 %1282 }
 0xd10   :  { %v2346_v39 = vpop.permute.xlu2 %1214 }
 0xd11   :  { %1701 = vmatmul.msk.f32.vlgmr.msrb.gmra.mxu0 %vm82_vm4, %v2346_v39  ;;  %1702 = vmatmul.msk.f32.vlgmr.msrb.gmra.mxu1 %vm82_vm4, %v2346_v39 }
 0xd71   :  { %v1123_v41 = vpop.permute.xlu1 %1122 }
 0xd72   :  { %v2354_v42 = vadd.f32 %v1123_v41, %v1115_v40 }
 0xd74   :  { %1829 = vtanh.f32 %v2354_v42 }
 0xd7a   :  { %v1830_v43 = vpop.eup %1829 }
 0xd7b   :  { %1128 = vrot.lane.b32.xlu2 %v1830_v43, %s1912_s3 }
 0xd8e   :  { %v1235_v14 = vpop.f32.mrf.mxu0  ;;  %v1255_v47 = vpop.f32.mrf.mxu1 }
 0xd8f   :  { %v1392_v48 = vadd.f32 %v1713_v9, %v1235_v14  ;;  %v1258_v13 = vadd.f32 %v1690_v34, %v1255_v47  ;;  %v1743_v34 = vld [vmem:[%s2447_s4 + $0x5] ss:$0 sm:$0xff]  ;;  %v1718_v9 = vld [vmem:[%s2444_s1 + $0x198] sm:$0xff] }
 0xd91   :  { %v1715_v50 = vmul.f32 -1.442695, %v1392_v48  ;;  %v1703_v51 = vmul.f32 -1.442695, %v1258_v13  ;;  %v1717_v48 = vld [vmem:[%s2444_s1 + $0x188] sm:$0xff] }
 0xd93   :  { %1831 = vpow2.f32 %v1715_v50 }
 0xd94   :  { %1833 = vpow2.f32 %v1703_v51 }
 0xd99   :  { %v1832_v53 = vpop.eup %1831 }
 0xd9a   :  { %v1834_v54 = vpop.eup %1833  ;;  %v1396_v56 = vadd.f32 1.0, %v1832_v53 }
 0xd9b   :  { %v1262_v57 = vadd.f32 1.0, %v1834_v54 }
 0xd9c   :  { %1835 = vrcp.f32 %v1396_v56  ;;  %v1408_v0 = vand.u32 2147483648, %v1396_v56  ;;  %v1406_v2 = vand.u32 2147483647, %v1396_v56  ;;  %vm1402_vm7 = vweird.f32 %v1396_v56 }
 0xd9d   :  { %1837 = vrcp.f32 %v1262_v57  ;;  %v1274_v35 = vand.u32 2147483648, %v1262_v57  ;;  %v1272_v4 = vand.u32 2147483647, %v1262_v57  ;;  %vm1268_vm8 = vweird.f32 %v1262_v57 }
 0xd9e   :  { %v1409_v7 = vor.u32 1.1754944e-38, %v1408_v0  ;;  %vm1407_vm11 = vcmp.eq.f32.partialorder %v1406_v2, 8.507059e+37  ;;  %v1714_v0 = vld [vmem:[%s2443_s0 + $0x68] sm:$0xff] }
 0xd9f   :  { %v1275_v8 = vor.u32 1.1754944e-38, %v1274_v35  ;;  %vm1273_vm12 = vcmp.eq.f32.partialorder %v1272_v4, 8.507059e+37  ;;  %v1727_v35 = vld [vmem:[%s2445_s2 + $0xd8] sm:$0xff] }
 0xda0   :  { %1515 = vmatpush.msra.mxu1 %v1727_v35 }
 0xda2   :  { %v1836_v58 = vpop.eup %1835 }
 0xda3   :  { %v1838_v59 = vpop.eup %1837  ;;  %v1398_v61 = vmul.f32 %v1836_v58, %v1396_v56  ;;  %vm1403_vm5 = vweird.f32 %v1836_v58 }
 0xda4   :  { %v1264_v62 = vmul.f32 %v1838_v59, %v1262_v57  ;;  %vm1269_vm6 = vweird.f32 %v1838_v59  ;;  %vm1404_vm9 = vmor %vm1402_vm7, %vm1403_vm5 }
 0xda5   :  { %v1399_v63 = vsub.f32 1.0, %v1398_v61  ;;  %vm1270_vm10 = vmor %vm1268_vm8, %vm1269_vm6 }
 0xda6   :  { %v1265_v32 = vsub.f32 1.0, %v1264_v62 }
 0xda7   :  { %v1400_v55 = vmul.f32 %v1836_v58, %v1399_v63 }
 0xda8   :  { %v1266_v3 = vmul.f32 %v1838_v59, %v1265_v32 }
 0xda9   :  { %v1401_v5 = vadd.f32 %v1836_v58, %v1400_v55  ;;  %v1726_v55 = vld [vmem:[%s2445_s2 + $0xd0] sm:$0xff] }
 0xdaa   :  { %v1267_v6 = vadd.f32 %v1838_v59, %v1266_v3  ;;  %1516 = vmatpush.msra.mxu1 %v1726_v55 }
 0xdab   :  { %v1405_v10 = vsel %vm1404_vm9, %v1836_v58, %v1401_v5 }
 0xdac   :  { %v1271_v37 = vsel %vm1270_vm10, %v1838_v59, %v1267_v6  ;;  %v2373_v11 = vsel %vm1407_vm11, %v1409_v7, %v1405_v10  ;;  %v1725_v7 = vld [vmem:[%s2445_s2 + $0xc8] sm:$0xff]  ;;  %v1724_v10 = vld [vmem:[%s2445_s2 + $0xc0] sm:$0xff] }
 0xdad   :  { %v1276_v12 = vsel %vm1273_vm12, %v1275_v8, %v1271_v37  ;;  %v1412_v15 = vmul.f32 2.0, %v2373_v11  ;;  %1517 = vmatpush.msra.mxu1 %v1725_v7 }
 0xdae   :  { %v1280_v16 = vsub.f32 1.0, %v1276_v12  ;;  %v1279_v19 = vmul.f32 %v1276_v12, %v2346_v39 }
 0xdaf   :  { %v1716_v18 = vadd.f32 -1.0, %v1412_v15  ;;  %1518 = vmatpush.msra.mxu1 %v1724_v10 }
 0xdb0   :  { %v1285_v20 = vmul.f32 %v1283_v45, %v1280_v16 }
 0xdb1   :  { %1416 = vrot.lane.b32.xlu2 %v1716_v18, %s1912_s3 }
 0xdb2   :  { %v1286_v21 = vadd.f32 %v1285_v20, %v1279_v19 }
 0xdb4   :  { %1709 = vmatmul.msk.f32.vlgmr.msrb.gmra.mxu2 %vm82_vm4, %v1286_v21 }
 0xdd5   :  { %v1129_v22 = vpop.permute.xlu2 %1128 }
 0xdd6   :  { %v1131_v60 = vmul.f32 %v1129_v22, %v2311_v17  ;;  %v1414_v17 = vmul.f32 %v2373_v11, %v2304_v1  ;;  %v1720_v1 = vld [vmem:[%s2444_s1 + $0x1b8] sm:$0xff] }
 0xdd7   :  { %1453 = vmatpush.msra.mxu0 %v1720_v1 }
 0xdd8   :  { %1138 = vrot.lane.b32.xlu1 %v1131_v60, %s1914_s19 }
 0xdd9   :  { %1454 = vmatpush.msra.mxu0 %v1719_v46 }
 0xddb   :  { %1455 = vmatpush.msra.mxu0 %v1718_v9 }
 0xddd   :  { %1456 = vmatpush.msra.mxu0 %v1717_v48 }
 0xe0b   :  { %v1417_v23 = vpop.permute.xlu2 %1416 }
 0xe0c   :  { %v1419_v24 = vmul.f32 %v1417_v23, %v2373_v11 }
 0xe0e   :  { %1421 = vrot.lane.b32.xlu0 %v1419_v24, %s1914_s19 }
 0xe37   :  { %v1317_v36 = vpop.f32.mrf.mxu2 }
 0xe38   :  { %v1318_v38 = vadd.f32 %v1743_v34, %v1317_v36  ;;  %v1744_v36 = vld [vmem:[%s2447_s4 + $0x6] ss:$0 sm:$0xff]  ;;  %s1915_s4 = smov [#allocation5]  }
 0xe39   :  { %s1572_s15 = sshll.u32 %s1915_s4, 4  ;;  %s1573_s15 = int_to_ptr.vmem [resolvable:$true] %s1572_s15 }
 0xe4a   :  { %v1139_v29 = vpop.permute.xlu1 %1138 }
 0xe4b   :  { %1688 = vmatmul.msk.f32.vlgmr.msra.gmra.mxu3 %vm82_vm4, %v1139_v29 }
 0xe80   :  { %v1422_v30 = vpop.permute.xlu0 %1421 }
 0xe81   :  { %v1424_v31 = vadd.f32 %v1422_v30, %v1414_v17  ;;  %v1363_v17 = vld [vmem:[#allocation2 + $0xb8] sm:$0xff]  ;;  %v1362_v30 = vld [vmem:[#allocation2 + $0xb0] sm:$0xff] }
 0xe82   :  { %1381 = vmatpush.msrb.mxu3 %v1363_v17 }
 0xe83   :  { %1839 = vtanh.f32 %v1424_v31  ;;  %v1361_v31 = vld [vmem:[#allocation2 + $0xa8] sm:$0xff] }
 0xe84   :  { %1382 = vmatpush.msrb.mxu3 %v1362_v30 }
 0xe86   :  { %1383 = vmatpush.msrb.mxu3 %v1361_v31 }
 0xe89   :  { %v1840_v33 = vpop.eup %1839 }
 0xe8a   :  { %1427 = vrot.lane.b32.xlu1 %v1840_v33, %s1912_s3  ;;  %v1360_v33 = vld [vmem:[#allocation2 + $0xa0] sm:$0xff] }
 0xe8b   :  { %1384 = vmatpush.msrb.mxu3 %v1360_v33 }
 0xece   :  { %v1159_v39 = vpop.f32.mrf.mxu3 }
 0xecf   :  { %v1320_v40 = vadd.f32 %v1318_v38, %v1159_v39 }
 0xed1   :  { %v1710_v41 = vmul.f32 -1.442695, %v1320_v40 }
 0xed3   :  { %1841 = vpow2.f32 %v1710_v41 }
 0xed9   :  { %v1842_v43 = vpop.eup %1841 }
 0xeda   :  { %v1324_v44 = vadd.f32 1.0, %v1842_v43 }
 0xedc   :  { %1843 = vrcp.f32 %v1324_v44  ;;  %v1336_v49 = vand.u32 2147483648, %v1324_v44  ;;  %v1334_v51 = vand.u32 2147483647, %v1324_v44  ;;  %vm1330_vm14 = vweird.f32 %v1324_v44 }
 0xede   :  { %v1337_v53 = vor.u32 1.1754944e-38, %v1336_v49  ;;  %vm1335_vm0 = vcmp.eq.f32.partialorder %v1334_v51, 8.507059e+37 }
 0xee2   :  { %v1844_v14 = vpop.eup %1843 }
 0xee3   :  { %v1326_v47 = vmul.f32 %v1844_v14, %v1324_v44  ;;  %vm1331_vm13 = vweird.f32 %v1844_v14 }
 0xee4   :  { %vm1332_vm15 = vmor %vm1330_vm14, %vm1331_vm13 }
 0xee5   :  { %v1327_v13 = vsub.f32 1.0, %v1326_v47 }
 0xee7   :  { %v1328_v50 = vmul.f32 %v1844_v14, %v1327_v13 }
 0xee9   :  { %v1329_v52 = vadd.f32 %v1844_v14, %v1328_v50 }
 0xeeb   :  { %v1333_v54 = vsel %vm1332_vm15, %v1844_v14, %v1329_v52 }
 0xeec   :  { %v1338_v56 = vsel %vm1335_vm0, %v1337_v53, %v1333_v54 }
 0xeed   :  { %v1340_v57 = vmul.f32 2.0, %v1338_v56  ;;  %v1342_v3 = vmul.f32 %v1338_v56, %v2354_v42 }
 0xeef   :  { %v1711_v58 = vadd.f32 -1.0, %v1340_v57 }
 0xef1   :  { %1344 = vrot.lane.b32.xlu0 %v1711_v58, %s1912_s3 }
 0xefc   :  { %v1428_v59 = vpop.permute.xlu1 %1427 }
 0xefd   :  { %v1430_v61 = vmul.f32 %v1428_v59, %v2373_v11 }
 0xeff   :  { %1437 = vrot.lane.b32.xlu2 %v1430_v61, %s1914_s19 }
 0xf59   :  { %v1438_v62 = vpop.permute.xlu2 %1437 }
 0xf5a   :  { %1721 = vmatmul.msk.f32.vlgmr.msra.gmra.mxu0 %vm82_vm4, %v1438_v62 }
 0xf63   :  { %v1345_v63 = vpop.permute.xlu0 %1344 }
 0xf64   :  { %v1347_v32 = vmul.f32 %v1345_v63, %v1338_v56 }
 0xf66   :  { %1349 = vrot.lane.b32.xlu1 %v1347_v32, %s1914_s19 }
 0xf6e   :  { %1485 = vrot.lane.b32.xlu1 %v1714_v0, %s1913_s27 }
 0xfd7   :  { %v1458_v2 = vpop.f32.mrf.mxu0 }
 0xfd8   :  { %v1461_v4 = vadd.f32 %v1714_v0, %v1458_v2  ;;  %v1350_v5 = vpop.permute.xlu1 %1349 }
 0xfd9   :  { %v2418_v6 = vadd.f32 %v1350_v5, %v1342_v3 }
 0xfda   :  { %v1722_v8 = vmul.f32 -1.442695, %v1461_v4 }
 0xfdb   :  { %1845 = vtanh.f32 %v2418_v6 }
 0xfdc   :  { %1847 = vpow2.f32 %v1722_v8 }
 0xfe0   :  { %v1486_v23 = vpop.permute.xlu1 %1485 }
 0xfe1   :  { %v1846_v37 = vpop.eup %1845 }
 0xfe2   :  { %v1848_v42 = vpop.eup %1847  ;;  %1355 = vrot.lane.b32.xlu2 %v1846_v37, %s1912_s3 }
 0xfe3   :  { %v1465_v11 = vadd.f32 1.0, %v1848_v42 }
 0xfe5   :  { %1849 = vrcp.f32 %v1465_v11  ;;  %v1477_v16 = vand.u32 2147483648, %v1465_v11  ;;  %v1475_v19 = vand.u32 2147483647, %v1465_v11  ;;  %vm1471_vm2 = vweird.f32 %v1465_v11 }
 0xfe7   :  { %v1478_v21 = vor.u32 1.1754944e-38, %v1477_v16  ;;  %vm1476_vm5 = vcmp.eq.f32.partialorder %v1475_v19, 8.507059e+37 }
 0xfeb   :  { %v1850_v12 = vpop.eup %1849 }
 0xfec   :  { %v1467_v45 = vmul.f32 %v1850_v12, %v1465_v11  ;;  %vm1472_vm1 = vweird.f32 %v1850_v12 }
 0xfed   :  { %vm1473_vm3 = vmor %vm1471_vm2, %vm1472_vm1 }
 0xfee   :  { %v1468_v15 = vsub.f32 1.0, %v1467_v45 }
 0xff0   :  { %v1469_v18 = vmul.f32 %v1850_v12, %v1468_v15 }
 0xff2   :  { %v1470_v20 = vadd.f32 %v1850_v12, %v1469_v18 }
 0xff4   :  { %v1474_v22 = vsel %vm1473_vm3, %v1850_v12, %v1470_v20 }
 0xff5   :  { %v1479_v60 = vsel %vm1476_vm5, %v1478_v21, %v1474_v22 }
 0xff6   :  { %v1483_v24 = vsub.f32 1.0, %v1479_v60  ;;  %v1482_v25 = vmul.f32 %v1479_v60, %v1438_v62 }
 0xff8   :  { %v1488_v26 = vmul.f32 %v1486_v23, %v1483_v24 }
 0xffa   :  { %v1489_v27 = vadd.f32 %v1488_v26, %v1482_v25 }
 0xffc   :  { %1728 = vmatmul.msk.f32.vlgmr.msra.gmra.mxu1 %vm82_vm4, %v1489_v27 }
0x103c   :  { %v1356_v28 = vpop.permute.xlu2 %1355 }
0x103d   :  { %v1358_v29 = vmul.f32 %v1356_v28, %v1338_v56 }
0x103f   :  { %1365 = vrot.lane.b32.xlu0 %v1358_v29, %s1914_s19 }
0x1079   :  { %v1520_v38 = vpop.f32.mrf.mxu1 }
0x107a   :  { %v1521_v39 = vadd.f32 %v1744_v36, %v1520_v38 }
0x10b1   :  { %v1366_v34 = vpop.permute.xlu0 %1365 }
0x10b2   :  { %1712 = vmatmul.msk.f32.vlgmr.msrb.gmra.mxu3 %vm82_vm4, %v1366_v34 }
0x1135   :  { %v1386_v40 = vpop.f32.mrf.mxu3 }
0x1136   :  { %v1523_v41 = vadd.f32 %v1521_v39, %v1386_v40 }
0x1138   :  { %v1729_v43 = vmul.f32 -1.442695, %v1523_v41 }
0x113a   :  { %1851 = vpow2.f32 %v1729_v43 }
0x1140   :  { %v1852_v44 = vpop.eup %1851 }
0x1141   :  { %v1527_v1 = vadd.f32 1.0, %v1852_v44 }
0x1143   :  { %1853 = vrcp.f32 %v1527_v1  ;;  %v1539_v47 = vand.u32 2147483648, %v1527_v1  ;;  %v1537_v13 = vand.u32 2147483647, %v1527_v1  ;;  %vm1533_vm7 = vweird.f32 %v1527_v1 }
0x1145   :  { %v1540_v50 = vor.u32 1.1754944e-38, %v1539_v47  ;;  %vm1538_vm9 = vcmp.eq.f32.partialorder %v1537_v13, 8.507059e+37 }
0x1149   :  { %v1854_v46 = vpop.eup %1853 }
0x114a   :  { %v1529_v9 = vmul.f32 %v1854_v46, %v1527_v1  ;;  %vm1534_vm6 = vweird.f32 %v1854_v46 }
0x114b   :  { %vm1535_vm8 = vmor %vm1533_vm7, %vm1534_vm6 }
0x114c   :  { %v1530_v14 = vsub.f32 1.0, %v1529_v9 }
0x114e   :  { %v1531_v48 = vmul.f32 %v1854_v46, %v1530_v14 }
0x1150   :  { %v1532_v49 = vadd.f32 %v1854_v46, %v1531_v48 }
0x1152   :  { %v1536_v51 = vsel %vm1535_vm8, %v1854_v46, %v1532_v49 }
0x1153   :  { %v1541_v52 = vsel %vm1538_vm9, %v1540_v50, %v1536_v51 }
0x1154   :  { %v1543_v53 = vmul.f32 2.0, %v1541_v52  ;;  %v1545_v58 = vmul.f32 %v1541_v52, %v2418_v6 }
0x1156   :  { %v1730_v54 = vadd.f32 -1.0, %v1543_v53 }
0x1158   :  { %1547 = vrot.lane.b32.xlu2 %v1730_v54, %s1912_s3 }
0x11b2   :  { %v1548_v56 = vpop.permute.xlu2 %1547 }
0x11b3   :  { %v1550_v57 = vmul.f32 %v1548_v56, %v1541_v52 }
0x11b5   :  { %1552 = vrot.lane.b32.xlu0 %v1550_v57, %s1914_s19 }
0x1227   :  { %v1553_v59 = vpop.permute.xlu0 %1552 }
0x1228   :  { %v1555_v61 = vadd.f32 %v1553_v59, %v1545_v58 }
0x122a   :  { %1855 = vtanh.f32 %v1555_v61 }
0x1230   :  { %v1856_v62 = vpop.eup %1855 }
0x1231   :  { %1558 = vrot.lane.b32.xlu1 %v1856_v62, %s1912_s3 }
0x12a3   :  { %v1559_v63 = vpop.permute.xlu1 %1558 }
0x12a4   :  { %v1561_v32 = vmul.f32 %v1559_v63, %v1541_v52 }
0x12a6   :  { %1563 = vrot.lane.b32.xlu2 %v1561_v32, %s1914_s19 }
0x1300   :  { %v1564_v0 = vpop.permute.xlu2 %1563 }
0x1301   :  { %1566 = vst.msk [vmem:[#allocation5] sm:$0xff] %vm82_vm4, %v1564_v0 }
0x1302   :  { %1577 = dma.vmem_to_hbm [thread:$0]  %s1573_s15, 128, %s1575_s18, [#allocation4]  }
0x1303   :  { %1907 = dma.done.wait [#allocation4], 128  }
0x1304   :  { %1908 = vsyncadd [#allocation4], 4294967168 }
0x1305   :  { %1582 = vsyncpa [#allocation3], 1 }
0x1306   :  { %1583 = vsyncpa [#allocation4], 1 }

</bundles_post_ra>
